<compile_context>
chip_gen: v7x
topology: tpu7x:2x2x1
jax: 0.10.0
libtpu: 0.0.40
codegen_flags: <defaults>
</compile_context>

<pallas_src>
from collections import OrderedDict
from functools import partial

import jax
import jax.numpy as jnp
from jax.experimental import pallas as pl
from jax.experimental.pallas import tpu as pltpu

BN_EPS = 1e-5


# ---------------------------------------------------------------------------
# Kernel 1: 3x3 conv (+ bias) with bf16 MXU inputs / f32 accumulation, plus
#           per-tile BatchNorm partial statistics (sum, sum of squares).
# ---------------------------------------------------------------------------
def _conv_stats_kernel(xcat_ref, w1_ref, b1_ref, y1_ref, stats_ref):
    # xcat_ref : (TH, W+2, 3*Cin) bf16  rows y-1/y/y+1 of the zero-padded map,
    #                                   concatenated on the channel (lane) axis
    # w1_ref   : (3, 3*Cin, Cmid) bf16  one (3*Cin, Cmid) matrix per column tap
    # b1_ref   : (1, Cmid)        f32
    # y1_ref   : (TH*W, Cmid)     f32   conv + bias output for this row tile
    # stats_ref: (1, 2, Cmid)     f32   per-tile [sum, sum-of-squares]
    th, wp2, c3 = xcat_ref.shape
    w = wp2 - 2
    cmid = w1_ref.shape[2]

    xb = xcat_ref[...]                                   # (TH, W+2, 3Cin) bf16
    acc = jnp.zeros((th * w, cmid), jnp.float32)
    for kx in range(3):                                  # static, fully unrolled
        # per-tile im2col: never round-trips HBM
        tap = xb[:, kx:kx + w, :].reshape(th * w, c3)    # (TH*W, 3*Cin) bf16
        acc = acc + jnp.dot(tap, w1_ref[kx],
                            preferred_element_type=jnp.float32)
    acc = acc + b1_ref[...]                              # conv bias (one broadcast)

    y1_ref[...] = acc
    # Per-tile BN partial sums.  Kept as f32 XLU reductions: the XLU is idle
    # here and f32 sums keep the E[x^2] - E[x]^2 variance numerically safe.
    stats_ref[0, 0:1, :] = jnp.sum(acc, axis=0, keepdims=True)
    stats_ref[0, 1:2, :] = jnp.sum(acc * acc, axis=0, keepdims=True)


# ---------------------------------------------------------------------------
# Kernel 2: folded BN affine + ReLU + 1x1 conv + sigmoid.
# ---------------------------------------------------------------------------
def _bn_relu_head_kernel(y1_ref, scale_ref, shift_ref, w2_ref, b2_ref, out_ref):
    # y1_ref : (TH*W, Cmid) f32 conv output tile
    # scale/shift : (1, Cmid) f32 folded batch-norm affine
    # w2_ref : (Cmid, Cout) f32, b2_ref : (1, Cout) f32
    # out_ref: (TH*W, Cout) f32 sigmoid scores
    h = jnp.maximum(y1_ref[...] * scale_ref[...] + shift_ref[...], 0.0)
    # 1x1 conv is tiny (K=Cmid, N=2): keep f32 inputs for accuracy.
    y = jnp.dot(h, w2_ref[...], preferred_element_type=jnp.float32) + b2_ref[...]
    out_ref[...] = jax.nn.sigmoid(y)


def _pick_row_tile(bh, w, bytes_per_row, target_bytes):
    """Largest divisor of B*H whose tile fits target_bytes while keeping the
    (TH*W, C) output blocks 8-row aligned (or covering the full extent)."""
    best = None
    for th in range(1, bh + 1):
        if bh % th:
            continue
        if (th * w) % 8 != 0 and th != bh:
            continue
        if th * bytes_per_row <= target_bytes:
            best = th
        elif best is None:
            best = th          # even the smallest legal tile overflows: take it
            break
    return best if best is not None else bh


def craft_head_forward(features_nchw, params, *, row_tile=None):
    """Pallas TPU implementation of CRAFTHead.forward (NCHW in, NCHW maps out)."""
    x = jnp.transpose(features_nchw, (0, 2, 3, 1)).astype(jnp.float32)   # NHWC
    B, H, W, Cin = x.shape
    w1, b1 = params["w1"], params["b1"]
    gamma, beta = params["gamma"], params["beta"]
    w2, b2 = params["w2"], params["b2"]
    Cmid = w1.shape[-1]
    Cout = w2.shape[-1]
    N = B * H * W
    BH = B * H

    # ---- layout plumbing (XLA): pad, row-shift + channel-concat, cast bf16 --
    xp = jnp.pad(x, ((0, 0), (1, 1), (1, 1), (0, 0)))                    # (B,H+2,W+2,Cin)
    xcat = jnp.concatenate([xp[:, s:s + H] for s in range(3)], axis=-1)  # (B,H,W+2,3Cin)
    xcat = xcat.reshape(BH, W + 2, 3 * Cin).astype(jnp.bfloat16)
    # weight for column tap kx, rows ordered (ky, cin) to match xcat channels
    w1t = jnp.transpose(w1, (1, 0, 2, 3)).reshape(3, 3 * Cin, Cmid).astype(jnp.bfloat16)
    b1r = b1.reshape(1, Cmid).astype(jnp.float32)

    # ---- generation-aware tile sizing (v7x: 64 MiB VMEM, v5e/v6e: 128 MiB) --
    vmem_cap = 64 * 1024 * 1024
    try:
        vmem_cap = int(getattr(pltpu.get_tpu_info(), "vmem_capacity_bytes", vmem_cap))
    except Exception:
        pass
    vmem_limit = int(min(vmem_cap // 2, 96 * 1024 * 1024))
    # double-buffered per-image-row VMEM footprint of the two kernels' blocks
    row_bytes = 2 * ((W + 2) * 3 * Cin * 2 + W * Cmid * 4 + W * Cout * 4)
    target = min(vmem_limit // 4, 4 * 1024 * 1024)
    TH = row_tile if row_tile is not None else _pick_row_tile(BH, W, row_bytes, target)
    assert BH % TH == 0, "row_tile must divide B*H"
    assert (TH * W) % 8 == 0 or TH == BH, "row_tile*W must be a multiple of 8"
    n_tiles = BH // TH
    TNR = TH * W                       # flattened output rows per tile

    cparams = pltpu.CompilerParams(dimension_semantics=("parallel",),
                                   vmem_limit_bytes=vmem_limit)

    # ---- pass 1: conv3x3 + bias, per-tile BN partial statistics -------------
    y1, stats = pl.pallas_call(
        _conv_stats_kernel,
        grid=(n_tiles,),
        in_specs=[
            pl.BlockSpec((TH, W + 2, 3 * Cin), lambda r: (r, 0, 0)),
            pl.BlockSpec((3, 3 * Cin, Cmid), lambda r: (0, 0, 0)),   # VMEM-resident
            pl.BlockSpec((1, Cmid), lambda r: (0, 0)),               # VMEM-resident
        ],
        out_specs=[
            pl.BlockSpec((TNR, Cmid), lambda r: (r, 0)),
            pl.BlockSpec((1, 2, Cmid), lambda r: (r, 0, 0)),
        ],
        out_shape=[
            jax.ShapeDtypeStruct((N, Cmid), jnp.float32),
            jax.ShapeDtypeStruct((n_tiles, 2, Cmid), jnp.float32),
        ],
        compiler_params=cparams,
    )(xcat, w1t, b1r)

    # ---- BatchNorm batch statistics (PyTorch training-mode, biased var) -----
    # For inference-mode BN, fold running_mean / running_var into scale/shift
    # here instead; the kernels are unchanged.
    tot = jnp.sum(stats, axis=0)                       # (2, Cmid) f32
    mean = tot[0] / N
    var = jnp.maximum(tot[1] / N - mean * mean, 0.0)   # guard tiny cancellation
    inv = jax.lax.rsqrt(var + BN_EPS)
    scale = (gamma * inv).reshape(1, Cmid).astype(jnp.float32)
    shift = (beta - mean * gamma * inv).reshape(1, Cmid).astype(jnp.float32)

    # ---- pass 2: BN affine + ReLU + 1x1 conv + sigmoid -----------------------
    out = pl.pallas_call(
        _bn_relu_head_kernel,
        grid=(n_tiles,),
        in_specs=[
            pl.BlockSpec((TNR, Cmid), lambda r: (r, 0)),
            pl.BlockSpec((1, Cmid), lambda r: (0, 0)),
            pl.BlockSpec((1, Cmid), lambda r: (0, 0)),
            pl.BlockSpec((Cmid, Cout), lambda r: (0, 0)),
            pl.BlockSpec((1, Cout), lambda r: (0, 0)),
        ],
        out_specs=pl.BlockSpec((TNR, Cout), lambda r: (r, 0)),
        out_shape=jax.ShapeDtypeStruct((N, Cout), jnp.float32),
        compiler_params=cparams,
    )(y1, scale, shift, w2.astype(jnp.float32), b2.reshape(1, Cout).astype(jnp.float32))

    y_nhwc = out.reshape(B, H, W, Cout)
    y_nchw = jnp.transpose(y_nhwc, (0, 3, 1, 2))
    return OrderedDict(region_score=y_nchw[:, 0:1, :, :],
                       affinity_score=y_nchw[:, 1:2, :, :])


def init_params(key, in_channels=32, out_channels=2):
    """Deterministic synthetic init matching CRAFTHead._initialize_weights."""
    cmid = in_channels // 2
    k1, k2 = jax.random.split(key)
    # kaiming_normal_(mode='fan_out', nonlinearity='relu'): std = sqrt(2/fan_out)
    std1 = (2.0 / (cmid * 3 * 3)) ** 0.5
    w1 = std1 * jax.random.normal(k1, (3, 3, in_channels, cmid), jnp.float32)
    b1 = jnp.zeros((cmid,), jnp.float32)
    gamma = jnp.ones((cmid,), jnp.float32)   # BN weight = 1
    beta = jnp.zeros((cmid,), jnp.float32)   # BN bias = 0
    std2 = (2.0 / (out_channels * 1 * 1)) ** 0.5
    w2 = std2 * jax.random.normal(k2, (cmid, out_channels), jnp.float32)
    b2 = jnp.zeros((out_channels,), jnp.float32)
    return dict(w1=w1, b1=b1, gamma=gamma, beta=beta, w2=w2, b2=b2)


def reference_forward(features_nchw, params):
    """Pure-JAX reference with the same semantics.  The 3x3 conv inputs are
    cast to bf16 (f32 accumulation) to match the kernel's MXU-native
    precision; everything else is f32."""
    x = jnp.transpose(features_nchw, (0, 2, 3, 1)).astype(jnp.float32)
    y = jax.lax.conv_general_dilated(
        x.astype(jnp.bfloat16), params["w1"].astype(jnp.bfloat16), (1, 1), "SAME",
        dimension_numbers=("NHWC", "HWIO", "NHWC"),
        preferred_element_type=jnp.float32) + params["b1"]
    mean = jnp.mean(y, axis=(0, 1, 2), keepdims=True)
    var = jnp.mean(jnp.square(y - mean), axis=(0, 1, 2), keepdims=True)
    y = (y - mean) * jax.lax.rsqrt(var + BN_EPS) * params["gamma"] + params["beta"]
    y = jnp.maximum(y, 0.0)
    y = jnp.einsum("bhwc,co->bhwo", y, params["w2"],
                   precision=jax.lax.Precision.HIGHEST) + params["b2"]
    y = jax.nn.sigmoid(y)
    y = jnp.transpose(y, (0, 3, 1, 2))
    return OrderedDict(region_score=y[:, 0:1], affinity_score=y[:, 1:2])


# TODO(synk): CRAFTPostProcessor (cv2 findContours / minAreaRect / fillPoly) is
# host-side OpenCV post-processing, not part of forward(); not a TPU kernel.

if __name__ == "__main__":
    key = jax.random.PRNGKey(0)
    k_x, k_p = jax.random.split(key)

    B, Cin, H, W = 2, 32, 16, 16  # small shapes consistent with the module
    features = jax.random.normal(k_x, (B, Cin, H, W), jnp.float32)  # NCHW input
    params = init_params(k_p, in_channels=Cin, out_channels=2)

    # row_tile=8 -> grid=(4,) so the tiled / pipelined path is exercised even
    # at this toy size (the auto-picker would choose a single tile here).
    fwd = jax.jit(partial(craft_head_forward, row_tile=8))
    out = fwd(features, params)
    jax.block_until_ready(out["region_score"])
    jax.block_until_ready(out["affinity_score"])

    ref = reference_forward(features, params)
    assert out["region_score"].shape == (B, 1, H, W)
    assert out["affinity_score"].shape == (B, 1, H, W)
    assert jnp.allclose(out["region_score"], ref["region_score"],
                        atol=2e-3, rtol=2e-3)
    assert jnp.allclose(out["affinity_score"], ref["affinity_score"],
                        atol=2e-3, rtol=2e-3)

    print("KERNEL_OK")
</pallas_src>

<mosaic_0001>
module attributes {stable_mosaic.version = 11 : i64} {
  func.func @_conv_stats_kernel(%arg0: i32, %arg1: memref<8x18x96xbf16, #tpu.memory_space<vmem>>, %arg2: memref<3x96x16xbf16, #tpu.memory_space<vmem>>, %arg3: memref<1x16xf32, #tpu.memory_space<vmem>>, %arg4: memref<128x16xf32, #tpu.memory_space<vmem>>, %arg5: memref<1x2x16xf32, #tpu.memory_space<vmem>>) attributes {dimension_semantics = [#tpu.dimension_semantics<parallel>], iteration_bounds = array<i64: 4>, scalar_prefetch = 0 : i64, scratch_operands = 0 : i64, tpu.core_type = #tpu.core_type<tc>, window_params = [{transform_indices = @transform_0, window_bounds = array<i64: 8, 18, 96>}, {pipeline_mode = #tpu.pipeline_mode<synchronous>, transform_indices = @transform_1, window_bounds = array<i64: 3, 96, 16>}, {pipeline_mode = #tpu.pipeline_mode<synchronous>, transform_indices = @transform_2, window_bounds = array<i64: 1, 16>}, {transform_indices = @transform_3, window_bounds = array<i64: 128, 16>}, {transform_indices = @transform_4, window_bounds = array<i64: 1, 2, 16>}]} {
    %c0 = arith.constant 0 : index
    %c0_0 = arith.constant 0 : index
    %c0_1 = arith.constant 0 : index
    %0 = vector.load %arg1[%c0, %c0_0, %c0_1] : memref<8x18x96xbf16, #tpu.memory_space<vmem>>, vector<8x18x96xbf16>
    %cst = arith.constant 0.000000e+00 : f32
    %1 = vector.broadcast %cst : f32 to vector<128x16xf32>
    %2 = vector.extract_strided_slice %0 {offsets = [0, 0, 0], sizes = [8, 16, 96], strides = [1, 1, 1]} : vector<8x18x96xbf16> to vector<8x16x96xbf16>
    %3 = vector.shape_cast %2 : vector<8x16x96xbf16> to vector<128x96xbf16>
    %c0_2 = arith.constant 0 : index
    %c0_3 = arith.constant 0 : index
    %c0_4 = arith.constant 0 : index
    %4 = vector.load %arg2[%c0_2, %c0_3, %c0_4] : memref<3x96x16xbf16, #tpu.memory_space<vmem>>, vector<1x96x16xbf16>
    %5 = vector.shape_cast %4 : vector<1x96x16xbf16> to vector<96x16xbf16>
    %cst_5 = arith.constant dense<0.000000e+00> : vector<128x16xf32>
    %6 = tpu.matmul %3, %5, %cst_5 {dimension_numbers = #tpu.dot_dimension_numbers<[1], [0], [0], [1], [0, 0, 1, 1], [], []>} : vector<128x96xbf16>, vector<96x16xbf16>, vector<128x16xf32> -> vector<128x16xf32>
    %7 = arith.addf %1, %6 : vector<128x16xf32>
    %8 = vector.extract_strided_slice %0 {offsets = [0, 1, 0], sizes = [8, 16, 96], strides = [1, 1, 1]} : vector<8x18x96xbf16> to vector<8x16x96xbf16>
    %9 = vector.shape_cast %8 : vector<8x16x96xbf16> to vector<128x96xbf16>
    %c1 = arith.constant 1 : index
    %c0_6 = arith.constant 0 : index
    %c0_7 = arith.constant 0 : index
    %10 = vector.load %arg2[%c1, %c0_6, %c0_7] : memref<3x96x16xbf16, #tpu.memory_space<vmem>>, vector<1x96x16xbf16>
    %11 = vector.shape_cast %10 : vector<1x96x16xbf16> to vector<96x16xbf16>
    %cst_8 = arith.constant dense<0.000000e+00> : vector<128x16xf32>
    %12 = tpu.matmul %9, %11, %cst_8 {dimension_numbers = #tpu.dot_dimension_numbers<[1], [0], [0], [1], [0, 0, 1, 1], [], []>} : vector<128x96xbf16>, vector<96x16xbf16>, vector<128x16xf32> -> vector<128x16xf32>
    %13 = arith.addf %7, %12 : vector<128x16xf32>
    %14 = vector.extract_strided_slice %0 {offsets = [0, 2, 0], sizes = [8, 16, 96], strides = [1, 1, 1]} : vector<8x18x96xbf16> to vector<8x16x96xbf16>
    %15 = vector.shape_cast %14 : vector<8x16x96xbf16> to vector<128x96xbf16>
    %c2 = arith.constant 2 : index
    %c0_9 = arith.constant 0 : index
    %c0_10 = arith.constant 0 : index
    %16 = vector.load %arg2[%c2, %c0_9, %c0_10] : memref<3x96x16xbf16, #tpu.memory_space<vmem>>, vector<1x96x16xbf16>
    %17 = vector.shape_cast %16 : vector<1x96x16xbf16> to vector<96x16xbf16>
    %cst_11 = arith.constant dense<0.000000e+00> : vector<128x16xf32>
    %18 = tpu.matmul %15, %17, %cst_11 {dimension_numbers = #tpu.dot_dimension_numbers<[1], [0], [0], [1], [0, 0, 1, 1], [], []>} : vector<128x96xbf16>, vector<96x16xbf16>, vector<128x16xf32> -> vector<128x16xf32>
    %19 = arith.addf %13, %18 : vector<128x16xf32>
    %c0_12 = arith.constant 0 : index
    %c0_13 = arith.constant 0 : index
    %20 = vector.load %arg3[%c0_12, %c0_13] : memref<1x16xf32, #tpu.memory_space<vmem>>, vector<1x16xf32>
    %21 = vector.broadcast %20 : vector<1x16xf32> to vector<128x16xf32>
    %22 = arith.addf %19, %21 : vector<128x16xf32>
    %c0_14 = arith.constant 0 : index
    %c0_15 = arith.constant 0 : index
    %23 = vector.load %arg4[%c0_14, %c0_15] : memref<128x16xf32, #tpu.memory_space<vmem>>, vector<128x16xf32>
    tpu.vector_store %arg4[%c0_14, %c0_15], %22 {strides = array<i32>} : memref<128x16xf32, #tpu.memory_space<vmem>>, vector<128x16xf32>,
    %cst_16 = arith.constant dense<0.000000e+00> : vector<16xf32>
    %24 = vector.multi_reduction <add>, %22, %cst_16 [0] : vector<128x16xf32> to vector<16xf32>
    %25 = vector.shape_cast %24 : vector<16xf32> to vector<1x16xf32>
    %c0_17 = arith.constant 0 : index
    %c0_18 = arith.constant 0 : index
    %c0_19 = arith.constant 0 : index
    %26 = vector.load %arg5[%c0_17, %c0_18, %c0_19] : memref<1x2x16xf32, #tpu.memory_space<vmem>>, vector<1x1x16xf32>
    %27 = vector.shape_cast %26 : vector<1x1x16xf32> to vector<1x16xf32>
    %28 = vector.shape_cast %25 : vector<1x16xf32> to vector<1x1x16xf32>
    tpu.vector_store %arg5[%c0_17, %c0_18, %c0_19], %28 {strides = array<i32>} : memref<1x2x16xf32, #tpu.memory_space<vmem>>, vector<1x1x16xf32>,
    %29 = arith.mulf %22, %22 : vector<128x16xf32>
    %cst_20 = arith.constant dense<0.000000e+00> : vector<16xf32>
    %30 = vector.multi_reduction <add>, %29, %cst_20 [0] : vector<128x16xf32> to vector<16xf32>
    %31 = vector.shape_cast %30 : vector<16xf32> to vector<1x16xf32>
    %c0_21 = arith.constant 0 : index
    %c1_22 = arith.constant 1 : index
    %c0_23 = arith.constant 0 : index
    %32 = vector.load %arg5[%c0_21, %c1_22, %c0_23] : memref<1x2x16xf32, #tpu.memory_space<vmem>>, vector<1x1x16xf32>
    %33 = vector.shape_cast %32 : vector<1x1x16xf32> to vector<1x16xf32>
    %34 = vector.shape_cast %31 : vector<1x16xf32> to vector<1x1x16xf32>
    tpu.vector_store %arg5[%c0_21, %c1_22, %c0_23], %34 {strides = array<i32>} : memref<1x2x16xf32, #tpu.memory_space<vmem>>, vector<1x1x16xf32>,
    return
  }
  func.func @transform_0(%arg0: i32) -> (i32, i32, i32) {
    %c0_i32 = arith.constant 0 : i32
    %c0_i32_0 = arith.constant 0 : i32
    %c0_i32_1 = arith.constant 0 : i32
    return %arg0, %c0_i32, %c0_i32_0 : i32, i32, i32
  }
  func.func @transform_1(%arg0: i32) -> (i32, i32, i32) {
    %c0_i32 = arith.constant 0 : i32
    %c0_i32_0 = arith.constant 0 : i32
    %c0_i32_1 = arith.constant 0 : i32
    %c0_i32_2 = arith.constant 0 : i32
    return %c0_i32, %c0_i32_0, %c0_i32_1 : i32, i32, i32
  }
  func.func @transform_2(%arg0: i32) -> (i32, i32) {
    %c0_i32 = arith.constant 0 : i32
    %c0_i32_0 = arith.constant 0 : i32
    %c0_i32_1 = arith.constant 0 : i32
    return %c0_i32, %c0_i32_0 : i32, i32
  }
  func.func @transform_3(%arg0: i32) -> (i32, i32) {
    %c0_i32 = arith.constant 0 : i32
    %c0_i32_0 = arith.constant 0 : i32
    return %arg0, %c0_i32 : i32, i32
  }
  func.func @transform_4(%arg0: i32) -> (i32, i32, i32) {
    %c0_i32 = arith.constant 0 : i32
    %c0_i32_0 = arith.constant 0 : i32
    %c0_i32_1 = arith.constant 0 : i32
    return %arg0, %c0_i32, %c0_i32_0 : i32, i32, i32
  }
}

module attributes {stable_mosaic.version = 11 : i64} {
  func.func @_bn_relu_head_kernel(%arg0: i32, %arg1: memref<128x16xf32, #tpu.memory_space<vmem>>, %arg2: memref<1x16xf32, #tpu.memory_space<vmem>>, %arg3: memref<1x16xf32, #tpu.memory_space<vmem>>, %arg4: memref<16x2xf32, #tpu.memory_space<vmem>>, %arg5: memref<1x2xf32, #tpu.memory_space<vmem>>, %arg6: memref<128x2xf32, #tpu.memory_space<vmem>>) attributes {dimension_semantics = [#tpu.dimension_semantics<parallel>], iteration_bounds = array<i64: 4>, scalar_prefetch = 0 : i64, scratch_operands = 0 : i64, tpu.core_type = #tpu.core_type<tc>, window_params = [{transform_indices = @transform_0, window_bounds = array<i64: 128, 16>}, {pipeline_mode = #tpu.pipeline_mode<synchronous>, transform_indices = @transform_1, window_bounds = array<i64: 1, 16>}, {pipeline_mode = #tpu.pipeline_mode<synchronous>, transform_indices = @transform_2, window_bounds = array<i64: 1, 16>}, {pipeline_mode = #tpu.pipeline_mode<synchronous>, transform_indices = @transform_3, window_bounds = array<i64: 16, 2>}, {pipeline_mode = #tpu.pipeline_mode<synchronous>, transform_indices = @transform_4, window_bounds = array<i64: 1, 2>}, {transform_indices = @transform_5, window_bounds = array<i64: 128, 2>}]} {
    %c0 = arith.constant 0 : index
    %c0_0 = arith.constant 0 : index
    %0 = vector.load %arg1[%c0, %c0_0] : memref<128x16xf32, #tpu.memory_space<vmem>>, vector<128x16xf32>
    %c0_1 = arith.constant 0 : index
    %c0_2 = arith.constant 0 : index
    %1 = vector.load %arg2[%c0_1, %c0_2] : memref<1x16xf32, #tpu.memory_space<vmem>>, vector<1x16xf32>
    %2 = vector.broadcast %1 : vector<1x16xf32> to vector<128x16xf32>
    %3 = arith.mulf %0, %2 : vector<128x16xf32>
    %c0_3 = arith.constant 0 : index
    %c0_4 = arith.constant 0 : index
    %4 = vector.load %arg3[%c0_3, %c0_4] : memref<1x16xf32, #tpu.memory_space<vmem>>, vector<1x16xf32>
    %5 = vector.broadcast %4 : vector<1x16xf32> to vector<128x16xf32>
    %6 = arith.addf %3, %5 : vector<128x16xf32>
    %cst = arith.constant 0.000000e+00 : f32
    %7 = vector.broadcast %cst : f32 to vector<128x16xf32>
    %8 = arith.maximumf %6, %7 : vector<128x16xf32>
    %c0_5 = arith.constant 0 : index
    %c0_6 = arith.constant 0 : index
    %9 = vector.load %arg4[%c0_5, %c0_6] : memref<16x2xf32, #tpu.memory_space<vmem>>, vector<16x2xf32>
    %cst_7 = arith.constant dense<0.000000e+00> : vector<128x2xf32>
    %10 = tpu.matmul %8, %9, %cst_7 {dimension_numbers = #tpu.dot_dimension_numbers<[1], [0], [0], [1], [0, 0, 1, 1], [], []>} : vector<128x16xf32>, vector<16x2xf32>, vector<128x2xf32> -> vector<128x2xf32>
    %c0_8 = arith.constant 0 : index
    %c0_9 = arith.constant 0 : index
    %11 = vector.load %arg5[%c0_8, %c0_9] : memref<1x2xf32, #tpu.memory_space<vmem>>, vector<1x2xf32>
    %12 = vector.broadcast %11 : vector<1x2xf32> to vector<128x2xf32>
    %13 = arith.addf %10, %12 : vector<128x2xf32>
    %14 = arith.negf %13 : vector<128x2xf32>
    %15 = math.exp %14 : vector<128x2xf32>
    %cst_10 = arith.constant 1.000000e+00 : f32
    %16 = vector.broadcast %cst_10 : f32 to vector<128x2xf32>
    %17 = arith.addf %16, %15 : vector<128x2xf32>
    %18 = arith.divf %16, %17 : vector<128x2xf32>
    %c0_11 = arith.constant 0 : index
    %c0_12 = arith.constant 0 : index
    %19 = vector.load %arg6[%c0_11, %c0_12] : memref<128x2xf32, #tpu.memory_space<vmem>>, vector<128x2xf32>
    tpu.vector_store %arg6[%c0_11, %c0_12], %18 {strides = array<i32>} : memref<128x2xf32, #tpu.memory_space<vmem>>, vector<128x2xf32>,
    return
  }
  func.func @transform_0(%arg0: i32) -> (i32, i32) {
    %c0_i32 = arith.constant 0 : i32
    %c0_i32_0 = arith.constant 0 : i32
    return %arg0, %c0_i32 : i32, i32
  }
  func.func @transform_1(%arg0: i32) -> (i32, i32) {
    %c0_i32 = arith.constant 0 : i32
    %c0_i32_0 = arith.constant 0 : i32
    %c0_i32_1 = arith.constant 0 : i32
    return %c0_i32, %c0_i32_0 : i32, i32
  }
  func.func @transform_2(%arg0: i32) -> (i32, i32) {
    %c0_i32 = arith.constant 0 : i32
    %c0_i32_0 = arith.constant 0 : i32
    %c0_i32_1 = arith.constant 0 : i32
    return %c0_i32, %c0_i32_0 : i32, i32
  }
  func.func @transform_3(%arg0: i32) -> (i32, i32) {
    %c0_i32 = arith.constant 0 : i32
    %c0_i32_0 = arith.constant 0 : i32
    %c0_i32_1 = arith.constant 0 : i32
    return %c0_i32, %c0_i32_0 : i32, i32
  }
  func.func @transform_4(%arg0: i32) -> (i32, i32) {
    %c0_i32 = arith.constant 0 : i32
    %c0_i32_0 = arith.constant 0 : i32
    %c0_i32_1 = arith.constant 0 : i32
    return %c0_i32, %c0_i32_0 : i32, i32
  }
  func.func @transform_5(%arg0: i32) -> (i32, i32) {
    %c0_i32 = arith.constant 0 : i32
    %c0_i32_0 = arith.constant 0 : i32
    return %arg0, %c0_i32 : i32, i32
  }
}

</mosaic_0001>

<bundles_post_ra>
// kernel: craft_head_forward.3
= control target key start
LH: loop header
LB: loop body
LE: loop exit
PB: predicated region body
PF: predicated region fallthrough
CT: control target
= control target key end

     0   :  { %s886_s18 = smov 0   ;;  %s1047_s0 = inlined_call_operand.vmem [shape: f32[512,16], index: 0, kind: input, shape index: {}]   ;;  %s1048_s1 = inlined_call_operand.vmem [shape: f32[1,16], index: 1, kind: input, shape index: {}]   ;;  %s1049_s2 = inlined_call_operand.vmem [shape: f32[1,16], index: 2, kind: input, shape index: {}]   ;;  %s1050_s3 = inlined_call_operand.vmem [shape: f32[16,2], index: 3, kind: input, shape index: {}]   ;;  %s1051_s4 = inlined_call_operand.vmem [shape: f32[1,2], index: 4, kind: input, shape index: {}]   ;;  %s1052_s5 = inlined_call_operand.vmem [shape: f32[512,2], index: 5, kind: output, shape index: {}]  }
   0x1 LB: > { %s678_s19 = sadd.s32 4294967295, %s854_s18   ;;  %p682_p0 = scmp.ge.s32.totalorder %s854_s18, 1  ;;  %s854_s18 = sphi %s886_s18, %s15_s18  }
   0x2   : > { %p188_p1 = scmp.lt.s32.totalorder %s854_s18, 5 }
   0x4   : > { %p189_p2 = pnand %p682_p0, %p188_p1 }
   0x5   : > { %v306_v0 = vld [vmem:[%s1050_s3] sm:$0xff] (!%p189_p2)  ;;  %v307_v1 = vld [vmem:[%s1050_s3 + $0x8] sm:$0xff] (!%p189_p2)  ;;  %s683_s24 = sshll.u32 (!%p189_p2), %s678_s19, 4  ;;  %vm315_vm0 = vcmask (!%p189_p2), 130048   ;;  %vm605_vm1 = vcmask (!%p189_p2), 15360  }
   0x6   : > { %192 = sbr.rel (%p189_p2) target bundleno = 293 (0x125), region = 40  ;;  %v770_v2 = vpack.c.bf16 (!%p189_p2), %v307_v1, %v306_v0  ;;  %p217_p3 = scmp.lt.s32.totalorder (!%p189_p2), %s683_s24, 63  ;;  %v906_v3 = vld [vmem:[%s1048_s1] ss:$0 sm:$0xff] (!%p189_p2) }
   0x7   : > { %v918_v4 = vld [vmem:[%s1049_s2] ss:$0 sm:$0xff] (!%p189_p2) }
   0x8   : > { %771 = vmatprep.subr.bf16.mxu0 (!%p189_p2), %v770_v2  ;;  %774 = vmatprep.subr.bf16.mxu1 (!%p189_p2), %v770_v2 }
   0x9   : > { %773 = vmatpush3.bf16.msra.mxu0 (!%p189_p2), %v770_v2  ;;  %775 = vmatpush3.bf16.msra.mxu1 (!%p189_p2), %v770_v2 }
   0xd   : > { %s1054_s24 = smov (!%p217_p3, %s683_s24), 63 }
   0xe   : > { %s684_s25 = sshll.u32 %s1054_s24, 3 }
   0xf   : > { %s913_s30 = scalar_lea.vmem %s1047_s0, %s684_s25  ;;  %s1010_s12 = scalar_lea.vmem %s1052_s5, %s684_s25 }
  0x10   : > { %v228_v5 = vld [vmem:[%s913_s30] sm:$0xff]  ;;  %v229_v7 = vld [vmem:[%s913_s30 + $0x8] sm:$0xff]  ;;  %v230_v12 = vld [vmem:[%s913_s30 + $0x10] sm:$0xff] }
  0x11   : > { %v236_v6 = vld [vmem:[%s913_s30 + $0x40] sm:$0xff]  ;;  %v251_v8 = vmul.f32 %v906_v3, %v228_v5  ;;  %v252_v10 = vmul.f32 %v906_v3, %v229_v7  ;;  %v237_v11 = vld [vmem:[%s913_s30 + $0x48] sm:$0xff]  ;;  %v238_v13 = vld [vmem:[%s913_s30 + $0x50] sm:$0xff]  ;;  %v253_v15 = vmul.f32 %v906_v3, %v230_v12 }
  0x12   : > { %v259_v9 = vmul.f32 %v906_v3, %v236_v6  ;;  %v260_v14 = vmul.f32 %v906_v3, %v237_v11  ;;  %v261_v16 = vmul.f32 %v906_v3, %v238_v13  ;;  %v231_v17 = vld [vmem:[%s913_s30 + $0x18] sm:$0xff]  ;;  %v232_v27 = vld [vmem:[%s913_s30 + $0x20] sm:$0xff]  ;;  %v233_v29 = vld [vmem:[%s913_s30 + $0x28] sm:$0xff] }
  0x13   : > { %v239_v18 = vld [vmem:[%s913_s30 + $0x58] sm:$0xff]  ;;  %v274_v19 = vadd.f32 %v918_v4, %v251_v8  ;;  %v275_v21 = vadd.f32 %v918_v4, %v252_v10  ;;  %v254_v22 = vmul.f32 %v906_v3, %v231_v17  ;;  %v276_v24 = vadd.f32 %v918_v4, %v253_v15  ;;  %v240_v28 = vld [vmem:[%s913_s30 + $0x60] sm:$0xff]  ;;  %v241_v34 = vld [vmem:[%s913_s30 + $0x68] sm:$0xff] }
  0x14   : > { %v282_v20 = vadd.f32 %v918_v4, %v259_v9  ;;  %v283_v23 = vadd.f32 %v918_v4, %v260_v14  ;;  %v284_v25 = vadd.f32 %v918_v4, %v261_v16  ;;  %v262_v26 = vmul.f32 %v906_v3, %v239_v18  ;;  %v234_v35 = vld [vmem:[%s913_s30 + $0x30] sm:$0xff]  ;;  %v235_v45 = vld [vmem:[%s913_s30 + $0x38] sm:$0xff]  ;;  %v987_v6 = vld [vmem:[%s1051_s4] ss:$0 sm:$0xff] }
  0x15   : > { %v290_v30 = vmax.f32 %v274_v19, 0.0  ;;  %v291_v32 = vmax.f32 %v275_v21, 0.0  ;;  %v277_v33 = vadd.f32 %v918_v4, %v254_v22  ;;  %v242_v36 = vld [vmem:[%s913_s30 + $0x70] sm:$0xff]  ;;  %v292_v38 = vmax.f32 %v276_v24, 0.0  ;;  %v243_v50 = vld [vmem:[%s913_s30 + $0x78] sm:$0xff] }
  0x16   : > { %v298_v31 = vmax.f32 %v282_v20, 0.0  ;;  %v299_v37 = vmax.f32 %v283_v23, 0.0  ;;  %v300_v39 = vmax.f32 %v284_v25, 0.0  ;;  %v285_v40 = vadd.f32 %v918_v4, %v262_v26 }
  0x17   : > { %746 = vmatprep.mubr.msk.f32.mxu0 %vm315_vm0, %v290_v30  ;;  %v293_v41 = vmax.f32 %v277_v33, 0.0  ;;  %v255_v42 = vmul.f32 %v906_v3, %v232_v27  ;;  %v263_v43 = vmul.f32 %v906_v3, %v240_v28  ;;  %v256_v44 = vmul.f32 %v906_v3, %v233_v29 }
  0x18   : > { %758 = vmatprep.mubr.msk.f32.mxu1 %vm315_vm0, %v298_v31  ;;  %747 = vmatmul.mubr.msk.f32.vlgmr.msra.gmra.mrb[0].mxu0 %vm315_vm0, %v291_v32  ;;  %v301_v46 = vmax.f32 %v285_v40, 0.0  ;;  %v264_v47 = vmul.f32 %v906_v3, %v241_v34  ;;  %v257_v48 = vmul.f32 %v906_v3, %v234_v35  ;;  %v265_v49 = vmul.f32 %v906_v3, %v242_v36 }
  0x19   : > { %759 = vmatmul.mubr.msk.f32.vlgmr.msra.gmra.mrb[0].mxu1 %vm315_vm0, %v299_v37  ;;  %749 = vmatprep.mubr.msk.f32.mxu0 %vm315_vm0, %v292_v38  ;;  %v278_v51 = vadd.f32 %v918_v4, %v255_v42  ;;  %v286_v52 = vadd.f32 %v918_v4, %v263_v43  ;;  %v279_v53 = vadd.f32 %v918_v4, %v256_v44 }
  0x1a   : > { %761 = vmatprep.mubr.msk.f32.mxu1 %vm315_vm0, %v300_v39  ;;  %v287_v54 = vadd.f32 %v918_v4, %v264_v47  ;;  %v280_v55 = vadd.f32 %v918_v4, %v257_v48  ;;  %v288_v56 = vadd.f32 %v918_v4, %v265_v49  ;;  %v258_v57 = vmul.f32 %v906_v3, %v235_v45 }
  0x1b   : > { %v294_v58 = vmax.f32 %v278_v51, 0.0  ;;  %v302_v59 = vmax.f32 %v286_v52, 0.0  ;;  %v266_v60 = vmul.f32 %v906_v3, %v243_v50  ;;  %v295_v61 = vmax.f32 %v279_v53, 0.0 }
  0x1c   : > { %750 = vmatmul.mubr.msk.f32.gmra.mrb[2].mxu0 %vm315_vm0, %v293_v41  ;;  %v303_v62 = vmax.f32 %v287_v54, 0.0  ;;  %v281_v63 = vadd.f32 %v918_v4, %v258_v57  ;;  %v296_v0 = vmax.f32 %v280_v55, 0.0  ;;  %v304_v1 = vmax.f32 %v288_v56, 0.0 }
  0x1d   : > { %762 = vmatmul.mubr.msk.f32.gmra.mrb[2].mxu1 %vm315_vm0, %v301_v46  ;;  %752 = vmatprep.mubr.msk.f32.mxu0 %vm315_vm0, %v294_v58  ;;  %v289_v2 = vadd.f32 %v918_v4, %v266_v60 }
  0x1e   : > { %764 = vmatprep.mubr.msk.f32.mxu1 %vm315_vm0, %v302_v59  ;;  %v297_v3 = vmax.f32 %v281_v63, 0.0 }
  0x1f   : > { %v305_v5 = vmax.f32 %v289_v2, 0.0 }
  0x20   : > { %753 = vmatmul.mubr.msk.f32.gmra.mrb[4].mxu0 %vm315_vm0, %v295_v61 }
  0x21   : > { %765 = vmatmul.mubr.msk.f32.gmra.mrb[4].mxu1 %vm315_vm0, %v303_v62  ;;  %755 = vmatprep.mubr.msk.f32.mxu0 %vm315_vm0, %v296_v0 }
  0x22   : > { %767 = vmatprep.mubr.msk.f32.mxu1 %vm315_vm0, %v304_v1 }
  0x24   : > { %756 = vmatmul.mubr.msk.f32.gmra.mrb[6].mxu0 %vm315_vm0, %v297_v3 }
  0x25   : > { %768 = vmatmul.mubr.msk.f32.gmra.mrb[6].mxu1 %vm315_vm0, %v305_v5 }
  0xeb   : > { %v748_v4 = vpop.f32.mrb[0].mxu0 }
  0xec   : > { %v760_v7 = vpop.f32.mrb[0].mxu1  ;;  %v436_v8 = vadd.f32 %v748_v4, %v987_v6  ;;  %v430_v10 = vpop.f32.mrb[1].mxu0 }
  0xed   : > { %v476_v9 = vadd.f32 %v760_v7, %v987_v6  ;;  %v470_v11 = vpop.f32.mrb[1].mxu1  ;;  %v431_v12 = vadd.f32 %v987_v6, %v430_v10 }
  0xee   : > { %v471_v13 = vadd.f32 %v987_v6, %v470_v11  ;;  %v707_v14 = vmul.f32 -1.442695, %v436_v8 }
  0xef   : > { %v715_v15 = vmul.f32 -1.442695, %v476_v9  ;;  %v706_v16 = vmul.f32 -1.442695, %v431_v12  ;;  %v751_v18 = vpop.f32.mrb[2].mxu0 }
  0xf0   : > { %v714_v17 = vmul.f32 -1.442695, %v471_v13  ;;  %v763_v19 = vpop.f32.mrb[2].mxu1  ;;  %784 = vpow2.f32 %v707_v14  ;;  %v446_v20 = vadd.f32 %v751_v18, %v987_v6  ;;  %v440_v22 = vpop.f32.mrb[3].mxu0 }
  0xf1   : > { %v486_v21 = vadd.f32 %v763_v19, %v987_v6  ;;  %v480_v23 = vpop.f32.mrb[3].mxu1  ;;  %786 = vpow2.f32 %v715_v15  ;;  %v441_v24 = vadd.f32 %v987_v6, %v440_v22 }
  0xf2   : > { %v481_v25 = vadd.f32 %v987_v6, %v480_v23  ;;  %788 = vpow2.f32 %v706_v16  ;;  %v709_v26 = vmul.f32 -1.442695, %v446_v20 }
  0xf3   : > { %v717_v27 = vmul.f32 -1.442695, %v486_v21  ;;  %790 = vpow2.f32 %v714_v17  ;;  %v708_v28 = vmul.f32 -1.442695, %v441_v24  ;;  %v754_v30 = vpop.f32.mrb[4].mxu0 }
  0xf4   : > { %v716_v29 = vmul.f32 -1.442695, %v481_v25  ;;  %v766_v31 = vpop.f32.mrb[4].mxu1  ;;  %792 = vpow2.f32 %v709_v26  ;;  %v456_v32 = vadd.f32 %v754_v30, %v987_v6  ;;  %v450_v34 = vpop.f32.mrb[5].mxu0 }
  0xf5   : > { %v496_v33 = vadd.f32 %v766_v31, %v987_v6  ;;  %v490_v35 = vpop.f32.mrb[5].mxu1  ;;  %794 = vpow2.f32 %v717_v27  ;;  %v451_v36 = vadd.f32 %v987_v6, %v450_v34 }
  0xf6   : > { %v491_v37 = vadd.f32 %v987_v6, %v490_v35  ;;  %796 = vpow2.f32 %v708_v28  ;;  %v711_v38 = vmul.f32 -1.442695, %v456_v32 }
  0xf7   : > { %v719_v39 = vmul.f32 -1.442695, %v496_v33  ;;  %798 = vpow2.f32 %v716_v29  ;;  %v710_v40 = vmul.f32 -1.442695, %v451_v36  ;;  %v757_v42 = vpop.f32.mrb[6].mxu0 }
  0xf8   : > { %v718_v41 = vmul.f32 -1.442695, %v491_v37  ;;  %v769_v43 = vpop.f32.mrb[6].mxu1  ;;  %800 = vpow2.f32 %v711_v38  ;;  %v466_v44 = vadd.f32 %v757_v42, %v987_v6  ;;  %v460_v45 = vpop.f32.mrb[7].mxu0 }
  0xf9   : > { %v500_v46 = vpop.f32.mrb[7].mxu1  ;;  %802 = vpow2.f32 %v719_v39  ;;  %v506_v1 = vadd.f32 %v769_v43, %v987_v6  ;;  %v461_v5 = vadd.f32 %v987_v6, %v460_v45 }
  0xfa   : > { %v785_v47 = vpop.eup %784  ;;  %804 = vpow2.f32 %v710_v40  ;;  %v713_v48 = vmul.f32 -1.442695, %v466_v44  ;;  %v501_v8 = vadd.f32 %v987_v6, %v500_v46 }
  0xfb   : > { %v787_v49 = vpop.eup %786  ;;  %v558_v50 = vadd.f32 1.0, %v785_v47  ;;  %806 = vpow2.f32 %v718_v41  ;;  %v721_v13 = vmul.f32 -1.442695, %v506_v1  ;;  %v712_v15 = vmul.f32 -1.442695, %v461_v5 }
  0xfc   : > { %v789_v51 = vpop.eup %788  ;;  %v566_v52 = vadd.f32 1.0, %v787_v49  ;;  %808 = vpow2.f32 %v713_v48  ;;  %v720_v17 = vmul.f32 -1.442695, %v501_v8 }
  0xfd   : > { %v791_v53 = vpop.eup %790  ;;  %810 = vrcp.f32 %v558_v50  ;;  %v557_v54 = vadd.f32 1.0, %v789_v51 }
  0xfe   : > { %v793_v55 = vpop.eup %792  ;;  %812 = vrcp.f32 %v566_v52  ;;  %v565_v56 = vadd.f32 1.0, %v791_v53 }
  0xff   : > { %v795_v57 = vpop.eup %794  ;;  %814 = vrcp.f32 %v557_v54  ;;  %v560_v58 = vadd.f32 1.0, %v793_v55 }
 0x100   : > { %v797_v59 = vpop.eup %796  ;;  %816 = vrcp.f32 %v565_v56  ;;  %v568_v60 = vadd.f32 1.0, %v795_v57 }
 0x101   : > { %v799_v61 = vpop.eup %798  ;;  %818 = vrcp.f32 %v560_v58  ;;  %v559_v62 = vadd.f32 1.0, %v797_v59 }
 0x102   : > { %v801_v63 = vpop.eup %800  ;;  %820 = vrcp.f32 %v568_v60  ;;  %v567_v0 = vadd.f32 1.0, %v799_v61 }
 0x103   : > { %v803_v2 = vpop.eup %802  ;;  %822 = vrcp.f32 %v559_v62  ;;  %v562_v3 = vadd.f32 1.0, %v801_v63 }
 0x104   : > { %v805_v4 = vpop.eup %804  ;;  %824 = vrcp.f32 %v567_v0  ;;  %v570_v7 = vadd.f32 1.0, %v803_v2 }
 0x105   : > { %v807_v9 = vpop.eup %806  ;;  %826 = vrcp.f32 %v562_v3  ;;  %v561_v10 = vadd.f32 1.0, %v805_v4 }
 0x106   : > { %v809_v11 = vpop.eup %808  ;;  %828 = vrcp.f32 %v570_v7  ;;  %v569_v12 = vadd.f32 1.0, %v807_v9 }
 0x107   : > { %v811_v14 = vpop.eup %810  ;;  %830 = vrcp.f32 %v561_v10  ;;  %v564_v6 = vadd.f32 1.0, %v809_v11 }
 0x108   : > { %v813_v16 = vpop.eup %812  ;;  %607 = vst.msk [vmem:[%s1010_s12 + $0x8] sm:$0xff] %vm605_vm1, %v811_v14  ;;  %832 = vrcp.f32 %v569_v12 }
 0x109   : > { %v815_v18 = vpop.eup %814  ;;  %615 = vst.msk [vmem:[%s1010_s12 + $0x48] sm:$0xff] %vm605_vm1, %v813_v16  ;;  %834 = vrcp.f32 %v564_v6 }
 0x10a   : > { %v817_v19 = vpop.eup %816  ;;  %606 = vst.msk [vmem:[%s1010_s12] sm:$0xff] %vm605_vm1, %v815_v18  ;;  %836 = vpow2.f32 %v721_v13 }
 0x10b   : > { %v819_v20 = vpop.eup %818  ;;  %614 = vst.msk [vmem:[%s1010_s12 + $0x40] sm:$0xff] %vm605_vm1, %v817_v19  ;;  %838 = vpow2.f32 %v712_v15 }
 0x10c   : > { %v821_v21 = vpop.eup %820  ;;  %609 = vst.msk [vmem:[%s1010_s12 + $0x18] sm:$0xff] %vm605_vm1, %v819_v20  ;;  %840 = vpow2.f32 %v720_v17 }
 0x10d   : > { %v823_v22 = vpop.eup %822  ;;  %617 = vst.msk [vmem:[%s1010_s12 + $0x58] sm:$0xff] %vm605_vm1, %v821_v21 }
 0x10e   : > { %v825_v23 = vpop.eup %824  ;;  %608 = vst.msk [vmem:[%s1010_s12 + $0x10] sm:$0xff] %vm605_vm1, %v823_v22 }
 0x10f   : > { %v827_v24 = vpop.eup %826  ;;  %616 = vst.msk [vmem:[%s1010_s12 + $0x50] sm:$0xff] %vm605_vm1, %v825_v23 }
 0x110   : > { %v829_v25 = vpop.eup %828  ;;  %611 = vst.msk [vmem:[%s1010_s12 + $0x28] sm:$0xff] %vm605_vm1, %v827_v24 }
 0x111   : > { %v831_v26 = vpop.eup %830  ;;  %619 = vst.msk [vmem:[%s1010_s12 + $0x68] sm:$0xff] %vm605_vm1, %v829_v25 }
 0x112   : > { %v833_v27 = vpop.eup %832  ;;  %610 = vst.msk [vmem:[%s1010_s12 + $0x20] sm:$0xff] %vm605_vm1, %v831_v26 }
 0x113   : > { %v835_v28 = vpop.eup %834  ;;  %618 = vst.msk [vmem:[%s1010_s12 + $0x60] sm:$0xff] %vm605_vm1, %v833_v27 }
 0x114   : > { %v837_v29 = vpop.eup %836  ;;  %613 = vst.msk [vmem:[%s1010_s12 + $0x38] sm:$0xff] %vm605_vm1, %v835_v28 }
 0x115   : > { %v839_v30 = vpop.eup %838  ;;  %v572_v31 = vadd.f32 1.0, %v837_v29 }
 0x116   : > { %v841_v32 = vpop.eup %840  ;;  %v563_v33 = vadd.f32 1.0, %v839_v30 }
 0x117   : > { %842 = vrcp.f32 %v572_v31  ;;  %v571_v34 = vadd.f32 1.0, %v841_v32 }
 0x118   : > { %844 = vrcp.f32 %v563_v33 }
 0x119   : > { %846 = vrcp.f32 %v571_v34 }
 0x121   : > { %v843_v35 = vpop.eup %842 }
 0x122   : > { %v845_v36 = vpop.eup %844  ;;  %621 = vst.msk [vmem:[%s1010_s12 + $0x78] sm:$0xff] %vm605_vm1, %v843_v35 }
 0x123   : > { %v847_v37 = vpop.eup %846  ;;  %612 = vst.msk [vmem:[%s1010_s12 + $0x30] sm:$0xff] %vm605_vm1, %v845_v36 }
 0x124   : > { %620 = vst.msk [vmem:[%s1010_s12 + $0x70] sm:$0xff] %vm605_vm1, %v847_v37 }
 0x125 PF: > { %s15_s18 = sadd.s32 1, %s854_s18  }
 0x126   : > { %p12_p4 = scmp.ge.s32.totalorder %s15_s18, 6  }
 0x128   :  { %14 = sbr.rel (!%p12_p4) target bundleno = 1 (0x1), region = 70 }

// kernel: craft_head_forward.2
= control target key start
LH: loop header
LB: loop body
LE: loop exit
PB: predicated region body
PF: predicated region fallthrough
CT: control target
= control target key end

     0   :  { %s1685_s15 = smov 0   ;;  %s2192_s0 = inlined_call_operand.vmem [shape: bf16[32,18,96], index: 0, kind: input, shape index: {}]   ;;  %s2193_s1 = inlined_call_operand.vmem [shape: bf16[3,96,16], index: 1, kind: input, shape index: {}]   ;;  %s2194_s2 = inlined_call_operand.vmem [shape: f32[1,16], index: 2, kind: input, shape index: {}]   ;;  %s2195_s3 = inlined_call_operand.vmem [shape: f32[512,16], index: 3, kind: output, shape index: {0}]   ;;  %s2196_s4 = inlined_call_operand.vmem [shape: f32[4,2,16], index: 4, kind: output, shape index: {1}]  }
   0x1 LB: > { %s1691_s16 = sadd.s32 4294967295, %s1658_s15   ;;  %p1340_p0 = scmp.ge.s32.totalorder %s1658_s15, 1  ;;  %s1658_s15 = sphi %s1685_s15, %s15_s15  }
   0x2   : > { %p167_p1 = scmp.lt.s32.totalorder %s1658_s15, 5 }
   0x4   : > { %p168_p2 = pnand %p1340_p0, %p167_p1 }
   0x5   : > { %v1626_v0 = vld [vmem:[%s2193_s1 + $0x30] sm:$0xff] (!%p168_p2)   ;;  %s1341_s19 = sshll.u32 (!%p168_p2), %s1691_s16, 3  ;;  %v1627_v1 = vld [vmem:[%s2193_s1] sm:$0xff] (!%p168_p2)   ;;  %v1628_v2 = vld [vmem:[%s2193_s1 + $0x38] sm:$0xff] (!%p168_p2)   ;;  %vm520_vm0 = vcmask (!%p168_p2), 785408   ;;  %vm847_vm4 = vcmask (!%p168_p2), 1042432  }
   0x6   : > { %171 = sbr.rel (%p168_p2) target bundleno = 329 (0x149), region = 32  ;;  %p199_p3 = scmp.lt.s32.totalorder (!%p168_p2), %s1341_s19, 31  ;;  %1489 = vmatprep.subr.bf16.mxu1 (!%p168_p2), %v1626_v0  ;;  %1517 = vmatprep.subr.bf16.mxu0 (!%p168_p2), %v1627_v1  ;;  %v1629_v3 = vld [vmem:[%s2193_s1 + $0x8] sm:$0xff] (!%p168_p2)   ;;  %v1630_v4 = vld [vmem:[%s2193_s1 + $0x40] sm:$0xff] (!%p168_p2)   ;;  %v1631_v5 = vld [vmem:[%s2193_s1 + $0x10] sm:$0xff] (!%p168_p2)   ;;  %vm848_vm5 = vcmask (!%p168_p2), 1046532  }
   0x7   : > { %1490 = vmatpush3.bf16.msra.mxu1 (!%p168_p2), %v1626_v0  ;;  %1518 = vmatpush3.bf16.msra.mxu0 (!%p168_p2), %v1627_v1  ;;  %v1632_v6 = vld [vmem:[%s2193_s1 + $0x48] sm:$0xff] (!%p168_p2)   ;;  %v1633_v7 = vld [vmem:[%s2193_s1 + $0x18] sm:$0xff] (!%p168_p2)   ;;  %v1634_v8 = vld [vmem:[%s2193_s1 + $0x50] sm:$0xff] (!%p168_p2)   ;;  %vm252_vm1 = vsmask.f32 (!%p168_p2), 3328  ;;  %s1343_s8 = sshll.u32 (!%p168_p2), %s1691_s16, 4 }
   0x8   : > { %1491 = vmatprep.subr.bf16.mxu1 (!%p168_p2), %v1628_v2  ;;  %1519 = vmatprep.subr.bf16.mxu0 (!%p168_p2), %v1629_v3  ;;  %v1635_v9 = vld [vmem:[%s2193_s1 + $0x20] sm:$0xff] (!%p168_p2)   ;;  %vm253_vm2 = vsmask.f32 (!%p168_p2), 7440  ;;  %v1636_v15 = vld [vmem:[%s2193_s1 + $0x58] sm:$0xff] (!%p168_p2)   ;;  %v1637_v30 = vld [vmem:[%s2193_s1 + $0x28] sm:$0xff] (!%p168_p2)   ;;  %p206_p4 = scmp.lt.s32.totalorder (!%p168_p2), %s1343_s8, 63 }
   0x9   : > { %vm1770_vm3 = vmor (!%p168_p2), %vm252_vm1, %vm253_vm2  ;;  %v1640_v48 = vld [vmem:[%s2193_s1 + $0x60] sm:$0xff] (!%p168_p2)   ;;  %vm1139_vm7 = vcmask (!%p168_p2), 130048   ;;  %p211_p5 = scmp.lt.s32.totalorder (!%p168_p2), %s1691_s16, 3  ;;  %vm1193_vm8 = vcmask (!%p168_p2), 122880  }
   0xa   : > { %vm1956_vm6 = vmor (!%p168_p2), %vm847_vm4, %vm848_vm5 }
   0xb   : > { %1492 = vmatpush3.bf16.msra.mxu1 (!%p168_p2), %v1628_v2  ;;  %1520 = vmatpush3.bf16.msra.mxu0 (!%p168_p2), %v1629_v3 }
   0xc   : > { %1493 = vmatprep.subr.bf16.mxu1 (!%p168_p2), %v1630_v4  ;;  %1521 = vmatprep.subr.bf16.mxu0 (!%p168_p2), %v1631_v5 }
   0xd   : > { %s2202_s19 = smov (!%p199_p3, %s1341_s19), 31  ;;  %s2204_s8 = smov (!%p206_p4, %s1343_s8), 63 }
   0xe   : > { %s1617_s30 = smul.u32 12, %s2202_s19  ;;  %s1344_s9 = sshll.u32 %s2204_s8, 3 }
   0xf   : > { %1494 = vmatpush3.bf16.msra.mxu1 %v1630_v4  ;;  %1522 = vmatpush3.bf16.msra.mxu0 %v1631_v5  ;;  %s2070_s14 = scalar_lea.vmem %s2195_s3, %s1344_s9  ;;  %s2206_s16 = smov (!%p211_p5, %s1691_s16), 3 }
  0x10   : > { %s1723_s11 = scalar_lea.vmem %s2192_s0, %s1617_s30  ;;  %1495 = vmatprep.subr.bf16.mxu1 %v1632_v6  ;;  %1523 = vmatprep.subr.bf16.mxu0 %v1633_v7  ;;  %s1345_s17 = sshll.u32 %s2206_s16, 1 }
  0x11   : > { %v1732_v10 = vld [vmem:[%s1723_s11] sm:$0xf]  ;;  %v1735_v11 = vld [vmem:[%s1723_s11 + $0x4] sm:$0xf]  ;;  %v1738_v12 = vld [vmem:[%s1723_s11 + $0x8] sm:$0x1]  ;;  %s214_s20 = scalar_lea.vmem %s2196_s4, %s1345_s17 }
  0x12   : > { %v256_v13 = vshrl.u32 %v1732_v10, 16  ;;  %v259_v14 = vshll.u32 %v1732_v10, 16  ;;  %v265_v16 = vshll.u32 %v1735_v11, 16  ;;  %v269_v17 = vshrl.u32 %v1735_v11, 16  ;;  %v1750_v20 = vld [vmem:[%s1723_s11 + $0xc] sm:$0xf] }
  0x13   : > { %v275_v18 = vshll.u32 %v1738_v12, 16  ;;  %v855_v19 = vrot.slane %v1738_v12, 5  ;;  %1496 = vmatpush3.bf16.msra.mxu1 %v1632_v6  ;;  %v1380_v23 = vcombine.low %v1732_v10, %v1735_v11  ;;  %v1755_v24 = vld [vmem:[%s1723_s11 + $0x10] sm:$0xf]  ;;  %v1758_v25 = vld [vmem:[%s1723_s11 + $0x14] sm:$0x1]  ;;  %1524 = vmatpush3.bf16.msra.mxu0 %v1633_v7 }
  0x14   : > { %v258_v21 = vrot.slane %v256_v13, 4  ;;  %v261_v22 = vrot.slane %v259_v14, 5  ;;  %1497 = vmatprep.subr.bf16.mxu1 %v1634_v8  ;;  %v267_v26 = vrot.slane %v265_v16, 5  ;;  %v271_v27 = vrot.slane %v269_v17, 4  ;;  %1525 = vmatprep.subr.bf16.mxu0 %v1635_v9  ;;  %v1783_v49 = vld [vmem:[%s1723_s11 + $0x18] sm:$0xf] }
  0x15   : > { %v277_v28 = vrot.slane %v275_v18, 5  ;;  %v280_v29 = vshrl.u32 %v1750_v20, 16  ;;  %1529 = vmatprep.mubr.msk.bf16.mxu0 %vm520_vm0, %v1380_v23  ;;  %v283_v32 = vshll.u32 %v1750_v20, 16  ;;  %v289_v33 = vshll.u32 %v1755_v24, 16  ;;  %v1788_v53 = vld [vmem:[%s1723_s11 + $0x1c] sm:$0xf] }
  0x16   : > { %v262_v31 = vor.u32 %v261_v22, %v258_v21  ;;  %v293_v34 = vshrl.u32 %v1755_v24, 16  ;;  %v272_v36 = vor.u32 %v271_v27, %v267_v26  ;;  %v299_v38 = vshll.u32 %v1758_v25, 16  ;;  %v1791_v54 = vld [vmem:[%s1723_s11 + $0x20] sm:$0x1]  ;;  %v1800_v60 = vld [vmem:[%s1723_s11 + $0x24] sm:$0xf] }
  0x17   : > { %v282_v37 = vrot.slane %v280_v29, 4  ;;  %v859_v39 = vrot.slane %v1755_v24, 5  ;;  %1498 = vmatpush3.bf16.msra.mxu1 %v1634_v8  ;;  %v285_v41 = vrot.slane %v283_v32, 5  ;;  %v291_v42 = vrot.slane %v289_v33, 5  ;;  %1526 = vmatpush3.bf16.msra.mxu0 %v1635_v9  ;;  %v1803_v1 = vld [vmem:[%s1723_s11 + $0x28] sm:$0xf] }
  0x18   : > { %v263_v40 = vrot.slane %v262_v31, 4  ;;  %v295_v43 = vrot.slane %v293_v34, 4  ;;  %1499 = vmatprep.subr.bf16.mxu1 %v1636_v15  ;;  %v273_v44 = vrot.slane %v272_v36, 4  ;;  %v301_v45 = vrot.slane %v299_v38, 5  ;;  %1527 = vmatprep.subr.bf16.mxu0 %v1637_v30  ;;  %v1807_v6 = vld [vmem:[%s1723_s11 + $0x2c] sm:$0x1] }
  0x19   : > { %v862_v46 = vrot.slane %v1758_v25, 5  ;;  %v1381_v47 = vcombine.low %v1750_v20, %v1755_v24  ;;  %v286_v51 = vor.u32 %v285_v41, %v282_v37  ;;  %v304_v55 = vshrl.u32 %v1783_v49, 16  ;;  %v1641_v9 = vld [vmem:[%s2193_s1 + $0x68] sm:$0xff]   ;;  %v1821_v21 = vld [vmem:[%s1723_s11 + $0x30] sm:$0xf] }
  0x1a   : > { %v268_v50 = vsel %vm1770_vm3, %v263_v40, %v267_v26  ;;  %v296_v52 = vor.u32 %v295_v43, %v291_v42  ;;  %v278_v56 = vsel %vm1770_vm3, %v273_v44, %v277_v28  ;;  %v307_v57 = vshll.u32 %v1783_v49, 16  ;;  %v1834_v32 = vld [vmem:[%s2193_s1 + $0x70] sm:$0xff]   ;;  %v1841_v38 = vld [vmem:[%s1723_s11 + $0x38] sm:$0x1] }
  0x1b   : > { %v313_v58 = vshll.u32 %v1788_v53, 16  ;;  %v317_v59 = vshrl.u32 %v1788_v53, 16  ;;  %1500 = vmatpush3.bf16.msra.mxu1 %v1636_v15  ;;  %v1358_v61 = vcombine.low %v268_v50, %v278_v56  ;;  %v287_v62 = vrot.slane %v286_v51, 4  ;;  %1528 = vmatpush3.bf16.msra.mxu0 %v1637_v30  ;;  %v1837_v33 = vld [vmem:[%s1723_s11 + $0x34] sm:$0xf] }
  0x1c   : > { %v297_v63 = vrot.slane %v296_v52, 4  ;;  %v306_v0 = vrot.slane %v304_v55, 4  ;;  %v309_v2 = vrot.slane %v307_v57, 5  ;;  %v323_v5 = vshll.u32 %v1791_v54, 16  ;;  %1573 = vmatprep.subr.bf16.mxu1 %v1640_v48  ;;  %1545 = vmatprep.subr.bf16.mxu0 %v1640_v48 }
  0x1d   : > { %v315_v3 = vrot.slane %v313_v58, 5  ;;  %v319_v4 = vrot.slane %v317_v59, 4  ;;  %1501 = vmatprep.mubr.msk.bf16.mxu1 %vm520_vm0, %v1358_v61  ;;  %v292_v7 = vsel %vm1770_vm3, %v287_v62, %v291_v42  ;;  %v1382_v13 = vcombine.low %v1783_v49, %v1788_v53  ;;  %v1860_v62 = vld [vmem:[%s1723_s11 + $0x40] sm:$0xf] }
  0x1e   : > { %v302_v8 = vsel %vm1770_vm3, %v297_v63, %v301_v45  ;;  %v328_v14 = vshrl.u32 %v1800_v60, 16  ;;  %v310_v16 = vor.u32 %v309_v2, %v306_v0  ;;  %v325_v18 = vrot.slane %v323_v5, 5  ;;  %1530 = vmatmul.mubr.msk.bf16.vlgmr.msra.gmra.mrb[0].mxu0 %vm520_vm0, %v1381_v47  ;;  %v1850_v45 = vld [vmem:[%s1723_s11 + $0x3c] sm:$0xf] }
  0x1f   : > { %v1359_v15 = vcombine.low %v292_v7, %v302_v8  ;;  %v320_v17 = vor.u32 %v319_v4, %v315_v3  ;;  %v331_v23 = vshll.u32 %v1800_v60, 16  ;;  %v337_v26 = vshll.u32 %v1803_v1, 16  ;;  %1546 = vmatpush3.bf16.msra.mxu0 %v1640_v48  ;;  %1533 = vmatprep.mubr.msk.bf16.mxu0 %vm520_vm0, %v1382_v13  ;;  %v1866_v0 = vld [vmem:[%s2193_s1 + $0x78] sm:$0xff]   ;;  %v1869_v7 = vld [vmem:[%s1723_s11 + $0x44] sm:$0x1] }
  0x20   : > { %v330_v22 = vrot.slane %v328_v14, 4  ;;  %v341_v27 = vshrl.u32 %v1803_v1, 16  ;;  %v311_v28 = vrot.slane %v310_v16, 4  ;;  %v347_v30 = vshll.u32 %v1807_v6, 16  ;;  %1547 = vmatprep.subr.bf16.mxu0 %v1641_v9 }
  0x21   : > { %1502 = vmatmul.mubr.msk.bf16.vlgmr.msra.gmra.mrb[0].mxu1 %vm520_vm0, %v1359_v15  ;;  %v321_v29 = vrot.slane %v320_v17, 4  ;;  %v1383_v31 = vcombine.low %v1800_v60, %v1803_v1  ;;  %v333_v34 = vrot.slane %v331_v23, 5  ;;  %v339_v36 = vrot.slane %v337_v26, 5  ;;  %v1887_v23 = vld [vmem:[%s1723_s11 + $0x48] sm:$0xf] }
  0x22   : > { %v343_v37 = vrot.slane %v341_v27, 4  ;;  %v352_v40 = vshrl.u32 %v1821_v21, 16  ;;  %v316_v41 = vsel %vm1770_vm3, %v311_v28, %v315_v3  ;;  %v349_v43 = vrot.slane %v347_v30, 5  ;;  %1579 = vmatpush3.bf16.msra.mxu1 %v1640_v48  ;;  %v1890_v26 = vld [vmem:[%s1723_s11 + $0x4c] sm:$0xf] }
  0x23   : > { %v326_v42 = vsel %vm1770_vm3, %v321_v29, %v325_v18  ;;  %v355_v44 = vshll.u32 %v1821_v21, 16  ;;  %v334_v50 = vor.u32 %v333_v34, %v330_v22  ;;  %1574 = vmatprep.subr.bf16.mxu1 %v1641_v9  ;;  %1548 = vmatpush3.bf16.msra.mxu0 %v1641_v9  ;;  %v361_v56 = vshll.u32 %v1837_v33, 16 }
  0x24   : > { %v1360_v47 = vcombine.low %v316_v41, %v326_v42  ;;  %v344_v51 = vor.u32 %v343_v37, %v339_v36  ;;  %v354_v52 = vrot.slane %v352_v40, 4  ;;  %v365_v57 = vshrl.u32 %v1837_v33, 16  ;;  %1549 = vmatprep.subr.bf16.mxu0 %v1834_v32 }
  0x25   : > { %v357_v55 = vrot.slane %v355_v44, 5  ;;  %v371_v58 = vshll.u32 %v1841_v38, 16  ;;  %v335_v48 = vrot.slane %v334_v50, 4  ;;  %v1384_v61 = vcombine.low %v1821_v21, %v1837_v33  ;;  %v1904_v44 = vld [vmem:[%s1723_s11 + $0x50] sm:$0x1] }
  0x26   : > { %1505 = vmatprep.mubr.msk.bf16.mxu1 %vm520_vm0, %v1360_v47  ;;  %v345_v59 = vrot.slane %v344_v51, 4  ;;  %v376_v63 = vshrl.u32 %v1850_v45, 16  ;;  %1580 = vmatpush3.bf16.msra.mxu1 %v1641_v9  ;;  %v363_v3 = vrot.slane %v361_v56, 5  ;;  %v367_v4 = vrot.slane %v365_v57, 4  ;;  %v1881_v9 = vld [vmem:[%s2193_s1 + $0x80] sm:$0xff]  }
  0x27   : > { %v358_v2 = vor.u32 %v357_v55, %v354_v52  ;;  %v373_v5 = vrot.slane %v371_v58, 5  ;;  %v340_v8 = vsel %vm1770_vm3, %v335_v48, %v339_v36  ;;  %1534 = vmatmul.mubr.msk.bf16.gmra.mrb[4].mxu0 %vm520_vm0, %v1383_v31  ;;  %v379_v15 = vshll.u32 %v1850_v45, 16  ;;  %1575 = vmatprep.subr.bf16.mxu1 %v1834_v32  ;;  %v1916_v58 = vld [vmem:[%s1723_s11 + $0x54] sm:$0xf]  ;;  %v1921_v48 = vld [vmem:[%s2193_s1 + $0x88] sm:$0xff]  }
  0x28   : > { %v350_v13 = vsel %vm1770_vm3, %v345_v59, %v349_v43  ;;  %v378_v14 = vrot.slane %v376_v63, 4  ;;  %1550 = vmatpush3.bf16.msra.mxu0 %v1834_v32  ;;  %v368_v18 = vor.u32 %v367_v4, %v363_v3  ;;  %1537 = vmatprep.mubr.msk.bf16.mxu0 %vm520_vm0, %v1384_v61  ;;  %v385_v22 = vshll.u32 %v1860_v62, 16 }
  0x29   : > { %v1361_v16 = vcombine.low %v340_v8, %v350_v13  ;;  %v359_v17 = vrot.slane %v358_v2, 4  ;;  %v381_v27 = vrot.slane %v379_v15, 5  ;;  %v389_v28 = vshrl.u32 %v1860_v62, 16  ;;  %1551 = vmatprep.subr.bf16.mxu0 %v1866_v0 }
  0x2a   : > { %v395_v29 = vshll.u32 %v1869_v7, 16  ;;  %v887_v30 = vrot.slane %v1860_v62, 5  ;;  %v369_v34 = vrot.slane %v368_v18, 4  ;;  %v387_v36 = vrot.slane %v385_v22, 5  ;;  %1581 = vmatpush3.bf16.msra.mxu1 %v1834_v32 }
  0x2b   : > { %1506 = vmatmul.mubr.msk.bf16.gmra.mrb[4].mxu1 %vm520_vm0, %v1361_v16  ;;  %v364_v31 = vsel %vm1770_vm3, %v359_v17, %v363_v3  ;;  %v890_v37 = vrot.slane %v1869_v7, 5  ;;  %v382_v40 = vor.u32 %v381_v27, %v378_v14  ;;  %v391_v41 = vrot.slane %v389_v28, 4  ;;  %1576 = vmatprep.subr.bf16.mxu1 %v1866_v0  ;;  %v1925_v3 = vld [vmem:[%s1723_s11 + $0x58] sm:$0xf]  ;;  %v1936_v16 = vld [vmem:[%s1723_s11 + $0x5c] sm:$0x1] }
  0x2c   : > { %v397_v42 = vrot.slane %v395_v29, 5  ;;  %v1385_v43 = vcombine.low %v1850_v45, %v1860_v62  ;;  %v374_v47 = vsel %vm1770_vm3, %v369_v34, %v373_v5  ;;  %1552 = vmatpush3.bf16.msra.mxu0 %v1866_v0  ;;  %v400_v50 = vshrl.u32 %v1887_v23, 16 }
  0x2d   : > { %v403_v51 = vshll.u32 %v1887_v23, 16  ;;  %v409_v52 = vshll.u32 %v1890_v26, 16  ;;  %v1362_v55 = vcombine.low %v364_v31, %v374_v47  ;;  %v383_v56 = vrot.slane %v382_v40, 4  ;;  %1553 = vmatprep.subr.bf16.mxu0 %v1881_v9 }
  0x2e   : > { %v392_v57 = vor.u32 %v391_v41, %v387_v36  ;;  %v413_v32 = vshrl.u32 %v1890_v26, 16  ;;  %v402_v59 = vrot.slane %v400_v50, 4  ;;  %v419_v2 = vshll.u32 %v1904_v44, 16  ;;  %1582 = vmatpush3.bf16.msra.mxu1 %v1866_v0 }
  0x2f   : > { %v405_v61 = vrot.slane %v403_v51, 5  ;;  %v411_v63 = vrot.slane %v409_v52, 5  ;;  %1509 = vmatprep.mubr.msk.bf16.mxu1 %vm520_vm0, %v1362_v55  ;;  %v388_v4 = vsel %vm1770_vm3, %v383_v56, %v387_v36  ;;  %1538 = vmatmul.mubr.msk.bf16.gmra.mrb[8].mxu0 %vm520_vm0, %v1385_v43  ;;  %v1386_v13 = vcombine.low %v1887_v23, %v1890_v26 }
  0x30   : > { %v393_v5 = vrot.slane %v392_v57, 4  ;;  %v415_v8 = vrot.slane %v413_v32, 4  ;;  %v421_v15 = vrot.slane %v419_v2, 5  ;;  %1554 = vmatpush3.bf16.msra.mxu0 %v1881_v9  ;;  %v424_v17 = vshrl.u32 %v1916_v58, 16  ;;  %1577 = vmatprep.subr.bf16.mxu1 %v1881_v9 }
  0x31   : > { %v406_v14 = vor.u32 %v405_v61, %v402_v59  ;;  %v427_v18 = vshll.u32 %v1916_v58, 16  ;;  %1541 = vmatprep.mubr.msk.bf16.mxu0 %vm520_vm0, %v1386_v13  ;;  %v433_v28 = vshll.u32 %v1925_v3, 16  ;;  %v437_v0 = vshrl.u32 %v1925_v3, 16  ;;  %1555 = vmatprep.subr.bf16.mxu0 %v1921_v48 }
  0x32   : > { %v398_v22 = vsel %vm1770_vm3, %v393_v5, %v397_v42  ;;  %v416_v27 = vor.u32 %v415_v8, %v411_v63  ;;  %v426_v34 = vrot.slane %v424_v17, 4  ;;  %v443_v42 = vshll.u32 %v1936_v16, 16  ;;  %1583 = vmatpush3.bf16.msra.mxu1 %v1881_v9 }
  0x33   : > { %v1363_v29 = vcombine.low %v388_v4, %v398_v22  ;;  %v407_v31 = vrot.slane %v406_v14, 4  ;;  %v429_v36 = vrot.slane %v427_v18, 5  ;;  %v435_v41 = vrot.slane %v433_v28, 5  ;;  %1578 = vmatprep.subr.bf16.mxu1 %v1921_v48 }
  0x34   : > { %v417_v40 = vrot.slane %v416_v27, 4  ;;  %v439_v43 = vrot.slane %v437_v0, 4  ;;  %v1387_v51 = vcombine.low %v1916_v58, %v1925_v3  ;;  %1556 = vmatpush3.bf16.msra.mxu0 %v1921_v48  ;;  %v1402_v55 = vrot.slane %v1732_v10, 9 }
  0x35   : > { %1510 = vmatmul.mubr.msk.bf16.gmra.mrb[8].mxu1 %vm520_vm0, %v1363_v29  ;;  %v412_v47 = vsel %vm1770_vm3, %v407_v31, %v411_v63  ;;  %v430_v50 = vor.u32 %v429_v36, %v426_v34  ;;  %v445_v32 = vrot.slane %v443_v42, 5  ;;  %v852_v59 = vrot.slane %v1735_v11, 5 }
  0x36   : > { %v422_v56 = vsel %vm1770_vm3, %v417_v40, %v421_v15  ;;  %v440_v57 = vor.u32 %v439_v43, %v435_v41  ;;  %v1406_v2 = vrot.slane %v1821_v21, 9  ;;  %v880_v4 = vrot.slane %v1837_v33, 5  ;;  %1584 = vmatpush3.bf16.msra.mxu1 %v1921_v48 }
  0x37   : > { %v1364_v61 = vcombine.low %v412_v47, %v422_v56  ;;  %v431_v63 = vrot.slane %v430_v50, 4  ;;  %1542 = vmatmul.mubr.msk.bf16.gmra.mrb[12].mxu0 %vm520_vm0, %v1387_v51  ;;  %v853_v10 = vsel %vm1956_vm6, %v1402_v55, %v852_v59  ;;  %v854_v8 = vrot.slane %v852_v59, 4 }
  0x38   : > { %v441_v5 = vrot.slane %v440_v57, 4  ;;  %v883_v13 = vrot.slane %v1841_v38, 5  ;;  %v881_v9 = vsel %vm1956_vm6, %v1406_v2, %v880_v4  ;;  %v882_v21 = vrot.slane %v880_v4, 4 }
  0x39   : > { %1513 = vmatprep.mubr.msk.bf16.mxu1 %vm520_vm0, %v1364_v61  ;;  %v436_v11 = vsel %vm1770_vm3, %v431_v63, %v435_v41  ;;  %v1403_v33 = vrot.slane %v1750_v20, 9  ;;  %v856_v38 = vsel %vm1956_vm6, %v854_v8, %v855_v19  ;;  %v861_v15 = vrot.slane %v859_v39, 4 }
  0x3a   : > { %v446_v14 = vsel %vm1770_vm3, %v441_v5, %v445_v32  ;;  %v1407_v17 = vrot.slane %v1850_v45, 9  ;;  %v1422_v22 = vcombine.low %v853_v10, %v856_v38  ;;  %v884_v20 = vsel %vm1956_vm6, %v882_v21, %v883_v13 }
  0x3b   : > { %v1365_v18 = vcombine.low %v436_v11, %v446_v14  ;;  %v860_v35 = vsel %vm1956_vm6, %v1403_v33, %v859_v39  ;;  %v1426_v48 = vcombine.low %v881_v9, %v884_v20  ;;  %v863_v12 = vsel %vm1956_vm6, %v861_v15, %v862_v46 }
  0x3c   : > { %v888_v19 = vsel %vm1956_vm6, %v1407_v17, %v887_v30  ;;  %v889_v45 = vrot.slane %v887_v30, 4  ;;  %1557 = vmatprep.mubr.msk.bf16.mxu0 %vm520_vm0, %v1422_v22  ;;  %v1423_v24 = vcombine.low %v860_v35, %v863_v12  ;;  %v1404_v39 = vrot.slane %v1783_v49, 9 }
  0x3d   : > { %1514 = vmatmul.mubr.msk.bf16.gmra.mrb[12].mxu1 %vm520_vm0, %v1365_v18  ;;  %v866_v25 = vrot.slane %v1788_v53, 5  ;;  %v869_v27 = vrot.slane %v1791_v54, 5  ;;  %v1408_v62 = vrot.slane %v1887_v23, 9  ;;  %v894_v30 = vrot.slane %v1890_v26, 5 }
  0x3e   : > { %1565 = vmatprep.mubr.msk.bf16.mxu1 %vm520_vm0, %v1426_v48  ;;  %v891_v46 = vsel %vm1956_vm6, %v889_v45, %v890_v37  ;;  %v897_v28 = vrot.slane %v1904_v44, 5  ;;  %v1405_v54 = vrot.slane %v1800_v60, 9  ;;  %v873_v37 = vrot.slane %v1803_v1, 5  ;;  %v2063_v45 = vld [vmem:[%s2194_s2] ss:$0 sm:$0xff] }
  0x3f   : > { %v1427_v0 = vcombine.low %v888_v19, %v891_v46  ;;  %v867_v49 = vsel %vm1956_vm6, %v1404_v39, %v866_v25  ;;  %v868_v53 = vrot.slane %v866_v25, 4  ;;  %1558 = vmatmul.mubr.msk.bf16.vlgmr.msra.gmra.mrb[0].mxu0 %vm520_vm0, %v1423_v24  ;;  %v895_v7 = vsel %vm1956_vm6, %v1408_v62, %v894_v30 }
  0x40   : > { %v896_v29 = vrot.slane %v894_v30, 4  ;;  %v876_v23 = vrot.slane %v1807_v6, 5  ;;  %v1409_v44 = vrot.slane %v1916_v58, 9  ;;  %v901_v31 = vrot.slane %v1925_v3, 5 }
  0x41   : > { %v870_v26 = vsel %vm1956_vm6, %v868_v53, %v869_v27  ;;  %v904_v34 = vrot.slane %v1936_v16, 5  ;;  %v874_v40 = vsel %vm1956_vm6, %v1405_v54, %v873_v37  ;;  %v875_v41 = vrot.slane %v873_v37, 4 }
  0x42   : > { %v1424_v60 = vcombine.low %v867_v49, %v870_v26  ;;  %v898_v36 = vsel %vm1956_vm6, %v896_v29, %v897_v28  ;;  %v903_v43 = vrot.slane %v901_v31, 4  ;;  %v902_v3 = vsel %vm1956_vm6, %v1409_v44, %v901_v31 }
  0x43   : > { %v1428_v1 = vcombine.low %v895_v7, %v898_v36  ;;  %v877_v6 = vsel %vm1956_vm6, %v875_v41, %v876_v23 }
  0x44   : > { %1561 = vmatprep.mubr.msk.bf16.mxu0 %vm520_vm0, %v1424_v60  ;;  %v1425_v58 = vcombine.low %v874_v40, %v877_v6  ;;  %v905_v16 = vsel %vm1956_vm6, %v903_v43, %v904_v34 }
  0x45   : > { %1566 = vmatmul.mubr.msk.bf16.vlgmr.msra.gmra.mrb[16].mxu1 %vm520_vm0, %v1427_v0  ;;  %v1429_v42 = vcombine.low %v902_v3, %v905_v16 }
  0x46   : > { %1569 = vmatprep.mubr.msk.bf16.mxu1 %vm520_vm0, %v1428_v1 }
  0x47   : > { %1562 = vmatmul.mubr.msk.bf16.gmra.mrb[4].mxu0 %vm520_vm0, %v1425_v58 }
  0x4d   : > { %1570 = vmatmul.mubr.msk.bf16.gmra.mrb[20].mxu1 %vm520_vm0, %v1429_v42 }
  0xf4   : > { %v1503_v47 = vpop.f32.mrb[0].mxu1 }
  0xf5   : > { %v579_v50 = vpop.f32.mrb[1].mxu1 }
  0xf6   : > { %v1504_v51 = vpop.f32.mrb[2].mxu1 }
  0xf7   : > { %v582_v55 = vpop.f32.mrb[3].mxu1 }
  0xfe   : > { %v2045_v56 = vpop.f32.mrb[4].mxu1 }
  0xff   : > { %v2047_v57 = vpop.f32.mrb[5].mxu1 }
 0x100   : > { %v2049_v32 = vpop.f32.mrb[6].mxu1 }
 0x101   : > { %v2051_v59 = vpop.f32.mrb[7].mxu1 }
 0x102   : > { %v1539_v52 = vpop.f32.mrb[8].mxu0 }
 0x103   : > { %v808_v61 = vpop.f32.mrb[9].mxu0 }
 0x104   : > { %v1540_v63 = vpop.f32.mrb[10].mxu0 }
 0x105   : > { %v811_v2 = vpop.f32.mrb[11].mxu0 }
 0x108   : > { %v1511_v4 = vpop.f32.mrb[8].mxu1 }
 0x109   : > { %v817_v5 = vadd.f32 %v1539_v52, %v1511_v4  ;;  %v611_v10 = vpop.f32.mrb[9].mxu1 }
 0x10a   : > { %v809_v8 = vadd.f32 %v808_v61, %v611_v10  ;;  %v1512_v13 = vpop.f32.mrb[10].mxu1  ;;  %v1543_v21 = vpop.f32.mrb[12].mxu0 }
 0x10b   : > { %v820_v11 = vadd.f32 %v1540_v63, %v1512_v13  ;;  %v614_v9 = vpop.f32.mrb[11].mxu1  ;;  %v824_v14 = vpop.f32.mrb[13].mxu0 }
 0x10c   : > { %v812_v33 = vadd.f32 %v811_v2, %v614_v9  ;;  %v1544_v38 = vpop.f32.mrb[14].mxu0 }
 0x10d   : > { %v827_v15 = vpop.f32.mrb[15].mxu0 }
 0x110   : > { %v1515_v17 = vpop.f32.mrb[12].mxu1 }
 0x111   : > { %v2054_v18 = vadd.f32 %v1543_v21, %v1515_v17  ;;  %v627_v22 = vpop.f32.mrb[13].mxu1 }
 0x112   : > { %v2056_v20 = vadd.f32 %v824_v14, %v627_v22  ;;  %v1516_v35 = vpop.f32.mrb[14].mxu1  ;;  %v1559_v19 = vpop.f32.mrb[0].mxu0 }
 0x113   : > { %v2058_v48 = vadd.f32 %v1544_v38, %v1516_v35  ;;  %v630_v12 = vpop.f32.mrb[15].mxu1  ;;  %v1585_v39 = vadd.f32 %v1559_v19, %v1503_v47  ;;  %v1037_v25 = vpop.f32.mrb[1].mxu0 }
 0x114   : > { %v2065_v24 = vadd.f32 %v827_v15, %v630_v12  ;;  %v1586_v27 = vadd.f32 %v1037_v25, %v579_v50  ;;  %v1560_v46 = vpop.f32.mrb[2].mxu0 }
 0x115   : > { %v1125_v62 = vadd.f32 %v1585_v39, %v2063_v45  ;;  %v1587_v30 = vadd.f32 %v1560_v46, %v1504_v51  ;;  %v1040_v28 = vpop.f32.mrb[3].mxu0 }
 0x116   : > { %v1123_v0 = vadd.f32 %v1586_v27, %v2063_v45  ;;  %v1588_v49 = vadd.f32 %v1040_v28, %v582_v55 }
 0x117   : > { %1142 = vst.msk [vmem:[%s2070_s14 + $0x10] sm:$0xff] %vm1139_vm7, %v1125_v62  ;;  %v1126_v54 = vadd.f32 %v1587_v30, %v2063_v45  ;;  %v1197_v23 = vmul.f32 %v1125_v62, %v1125_v62  ;;  %v1159_v16 = vsel %vm1139_vm7, %v1125_v62, 0.0 }
 0x118   : > { %v1567_v53 = vpop.f32.mrb[16].mxu1  ;;  %1140 = vst.msk [vmem:[%s2070_s14] sm:$0xff] %vm1139_vm7, %v1123_v0  ;;  %v1124_v37 = vadd.f32 %v1588_v49, %v2063_v45  ;;  %v1195_v26 = vmul.f32 %v1123_v0, %v1123_v0  ;;  %v1156_v60 = vsel %vm1139_vm7, %v1123_v0, 0.0 }
 0x119   : > { %v1110_v7 = vadd.f32 %v1567_v53, %v817_v5  ;;  %v1069_v29 = vpop.f32.mrb[17].mxu1  ;;  %1143 = vst.msk [vmem:[%s2070_s14 + $0x18] sm:$0xff] %vm1139_vm7, %v1126_v54  ;;  %v1198_v55 = vmul.f32 %v1126_v54, %v1126_v54  ;;  %v1214_v2 = vsel %vm1139_vm7, %v1197_v23, 0.0  ;;  %v1161_v5 = vsel %vm1139_vm7, %v1126_v54, 0.0 }
 0x11a   : > { %v1108_v44 = vadd.f32 %v1069_v29, %v809_v8  ;;  %v1568_v31 = vpop.f32.mrb[18].mxu1  ;;  %1141 = vst.msk [vmem:[%s2070_s14 + $0x8] sm:$0xff] %vm1139_vm7, %v1124_v37  ;;  %v1157_v40 = vsel %vm1139_vm7, %v1124_v37, 0.0  ;;  %v1563_v1 = vpop.f32.mrb[4].mxu0  ;;  %v1196_v58 = vmul.f32 %v1124_v37, %v1124_v37  ;;  %v1211_v51 = vsel %vm1139_vm7, %v1195_v26, 0.0 }
 0x11b   : > { %v2083_v34 = vadd.f32 %v2063_v45, %v1110_v7  ;;  %v1111_v36 = vadd.f32 %v1568_v31, %v820_v11  ;;  %v1072_v41 = vpop.f32.mrb[19].mxu1  ;;  %v1158_v6 = vadd.f32 %v1157_v40, %v1156_v60  ;;  %v1053_v3 = vpop.f32.mrb[5].mxu0  ;;  %v1589_v8 = vadd.f32 %v1563_v1, %v2045_v56 }
 0x11c   : > { %v2090_v43 = vadd.f32 %v2063_v45, %v1108_v44  ;;  %v1109_v47 = vadd.f32 %v1072_v41, %v812_v33  ;;  %v1564_v50 = vpop.f32.mrb[6].mxu0  ;;  %v1212_v61 = vsel %vm1139_vm7, %v1196_v58, 0.0  ;;  %v1590_v11 = vadd.f32 %v1053_v3, %v2047_v57 }
 0x11d   : > { %1150 = vst.msk [vmem:[%s2070_s14 + $0x50] sm:$0xff] %vm1139_vm7, %v2083_v34  ;;  %v2097_v42 = vadd.f32 %v2063_v45, %v1111_v36  ;;  %v1160_v52 = vadd.f32 %v1159_v16, %v1158_v6  ;;  %v1056_v63 = vpop.f32.mrb[7].mxu0  ;;  %v1213_v4 = vadd.f32 %v1212_v61, %v1211_v51  ;;  %v1216_v38 = vsel %vm1139_vm7, %v1198_v55, 0.0 }
 0x11e   : > { %1148 = vst.msk [vmem:[%s2070_s14 + $0x40] sm:$0xff] %vm1139_vm7, %v2090_v43  ;;  %v1132_v10 = vadd.f32 %v2063_v45, %v1109_v47  ;;  %v1129_v15 = vadd.f32 %v1589_v8, %v2063_v45  ;;  %v1127_v17 = vadd.f32 %v1590_v11, %v2063_v45  ;;  %v1592_v62 = vadd.f32 %v1056_v63, %v2051_v59 }
 0x11f   : > { %1151 = vst.msk [vmem:[%s2070_s14 + $0x58] sm:$0xff] %vm1139_vm7, %v2097_v42  ;;  %v1215_v9 = vadd.f32 %v1214_v2, %v1213_v4  ;;  %v1162_v33 = vadd.f32 %v1161_v5, %v1160_v52  ;;  %v1203_v44 = vmul.f32 %v2090_v43, %v2090_v43  ;;  %v1171_v36 = vsel %vm1139_vm7, %v2090_v43, 0.0 }
 0x120   : > { %v1571_v13 = vpop.f32.mrb[20].mxu1  ;;  %1149 = vst.msk [vmem:[%s2070_s14 + $0x48] sm:$0xff] %vm1139_vm7, %v1132_v10  ;;  %1146 = vst.msk [vmem:[%s2070_s14 + $0x30] sm:$0xff] %vm1139_vm7, %v1129_v15  ;;  %v1163_v19 = vsel %vm1139_vm7, %v1127_v17, 0.0  ;;  %v1199_v25 = vmul.f32 %v1127_v17, %v1127_v17  ;;  %v1128_v49 = vadd.f32 %v1592_v62, %v2063_v45  ;;  %v1201_v59 = vmul.f32 %v1129_v15, %v1129_v15 }
 0x121   : > { %v1114_v21 = vadd.f32 %v1571_v13, %v2054_v18  ;;  %v1085_v14 = vpop.f32.mrb[21].mxu1  ;;  %v1217_v57 = vadd.f32 %v1216_v38, %v1215_v9  ;;  %v1591_v18 = vadd.f32 %v1564_v50, %v2049_v32  ;;  %1144 = vst.msk [vmem:[%s2070_s14 + $0x20] sm:$0xff] %vm1139_vm7, %v1127_v17  ;;  %v1164_v39 = vadd.f32 %v1163_v19, %v1162_v33 }
 0x122   : > { %v1572_v56 = vpop.f32.mrb[22].mxu1  ;;  %v1112_v35 = vadd.f32 %v1085_v14, %v2056_v20  ;;  %v1218_v46 = vsel %vm1139_vm7, %v1199_v25, 0.0  ;;  %1145 = vst.msk [vmem:[%s2070_s14 + $0x28] sm:$0xff] %vm1139_vm7, %v1128_v49  ;;  %v1200_v54 = vmul.f32 %v1128_v49, %v1128_v49  ;;  %v1167_v7 = vsel %vm1139_vm7, %v1129_v15, 0.0 }
 0x123   : > { %v2119_v22 = vadd.f32 %v2063_v45, %v1114_v21  ;;  %v1088_v12 = vpop.f32.mrb[23].mxu1  ;;  %v1130_v32 = vadd.f32 %v1591_v18, %v2063_v45  ;;  %v1115_v27 = vadd.f32 %v1572_v56, %v2058_v48  ;;  %v1219_v28 = vadd.f32 %v1218_v46, %v1217_v57 }
 0x124   : > { %v1135_v20 = vadd.f32 %v2063_v45, %v1112_v35  ;;  %v1113_v30 = vadd.f32 %v1088_v12, %v2065_v24  ;;  %v1165_v48 = vsel %vm1139_vm7, %v1128_v49, 0.0  ;;  %v1220_v23 = vsel %vm1139_vm7, %v1200_v54, 0.0 }
 0x125   : > { %1154 = vst.msk [vmem:[%s2070_s14 + $0x70] sm:$0xff] %vm1139_vm7, %v2119_v22  ;;  %1147 = vst.msk [vmem:[%s2070_s14 + $0x38] sm:$0xff] %vm1139_vm7, %v1130_v32  ;;  %v1138_v0 = vadd.f32 %v2063_v45, %v1115_v27  ;;  %v1166_v24 = vadd.f32 %v1165_v48, %v1164_v39  ;;  %v1202_v29 = vmul.f32 %v1130_v32, %v1130_v32  ;;  %v1169_v26 = vsel %vm1139_vm7, %v1130_v32, 0.0 }
 0x126   : > { %1152 = vst.msk [vmem:[%s2070_s14 + $0x60] sm:$0xff] %vm1139_vm7, %v1135_v20  ;;  %v1136_v53 = vadd.f32 %v2063_v45, %v1113_v30  ;;  %v1221_v45 = vadd.f32 %v1220_v23, %v1219_v28  ;;  %v1222_v31 = vsel %vm1139_vm7, %v1201_v59, 0.0  ;;  %v1204_v41 = vmul.f32 %v1132_v10, %v1132_v10 }
 0x127   : > { %1155 = vst.msk [vmem:[%s2070_s14 + $0x78] sm:$0xff] %vm1139_vm7, %v1138_v0  ;;  %v1168_v37 = vadd.f32 %v1167_v7, %v1166_v24  ;;  %v1224_v1 = vsel %vm1139_vm7, %v1202_v29, 0.0  ;;  %v1173_v58 = vsel %vm1139_vm7, %v1132_v10, 0.0  ;;  %v1205_v16 = vmul.f32 %v2083_v34, %v2083_v34 }
 0x128   : > { %1153 = vst.msk [vmem:[%s2070_s14 + $0x68] sm:$0xff] %vm1139_vm7, %v1136_v53  ;;  %v1223_v40 = vadd.f32 %v1222_v31, %v1221_v45  ;;  %v1226_v47 = vsel %vm1139_vm7, %v1203_v44, 0.0  ;;  %v1175_v51 = vsel %vm1139_vm7, %v2083_v34, 0.0  ;;  %v1206_v43 = vmul.f32 %v2097_v42, %v2097_v42 }
 0x129   : > { %v1170_v60 = vadd.f32 %v1169_v26, %v1168_v37  ;;  %v1228_v52 = vsel %vm1139_vm7, %v1204_v41, 0.0  ;;  %v1177_v63 = vsel %vm1139_vm7, %v2097_v42, 0.0  ;;  %v1230_v4 = vsel %vm1139_vm7, %v1205_v16, 0.0 }
 0x12a   : > { %v1225_v3 = vadd.f32 %v1224_v1, %v1223_v40  ;;  %v1207_v5 = vmul.f32 %v1135_v20, %v1135_v20  ;;  %v1179_v8 = vsel %vm1139_vm7, %v1135_v20, 0.0  ;;  %v1232_v34 = vsel %vm1139_vm7, %v1206_v43, 0.0 }
 0x12b   : > { %v1172_v6 = vadd.f32 %v1171_v36, %v1170_v60  ;;  %v1208_v9 = vmul.f32 %v1136_v53, %v1136_v53  ;;  %v1181_v21 = vsel %vm1139_vm7, %v1136_v53, 0.0  ;;  %v1209_v14 = vmul.f32 %v2119_v22, %v2119_v22 }
 0x12c   : > { %v1227_v55 = vadd.f32 %v1226_v47, %v1225_v3  ;;  %v1234_v42 = vsel %vm1139_vm7, %v1207_v5, 0.0  ;;  %v1183_v15 = vsel %vm1139_vm7, %v2119_v22, 0.0  ;;  %v1210_v56 = vmul.f32 %v1138_v0, %v1138_v0 }
 0x12d   : > { %v1174_v50 = vadd.f32 %v1173_v58, %v1172_v6  ;;  %v1236_v35 = vsel %vm1139_vm7, %v1208_v9, 0.0  ;;  %v1185_v18 = vsel %vm1139_vm7, %v1138_v0, 0.0  ;;  %v1238_v19 = vsel %vm1139_vm7, %v1209_v14, 0.0 }
 0x12e   : > { %v1229_v2 = vadd.f32 %v1228_v52, %v1227_v55  ;;  %v1240_v20 = vsel %vm1139_vm7, %v1210_v56, 0.0 }
 0x12f   : > { %v1176_v61 = vadd.f32 %v1175_v51, %v1174_v50 }
 0x130   : > { %v1231_v13 = vadd.f32 %v1230_v4, %v1229_v2 }
 0x131   : > { %v1178_v10 = vadd.f32 %v1177_v63, %v1176_v61 }
 0x132   : > { %v1233_v33 = vadd.f32 %v1232_v34, %v1231_v13 }
 0x133   : > { %v1180_v11 = vadd.f32 %v1179_v8, %v1178_v10 }
 0x134   : > { %v1235_v17 = vadd.f32 %v1234_v42, %v1233_v33 }
 0x135   : > { %v1182_v38 = vadd.f32 %v1181_v21, %v1180_v11 }
 0x136   : > { %v1237_v12 = vadd.f32 %v1236_v35, %v1235_v17 }
 0x137   : > { %v1184_v57 = vadd.f32 %v1183_v15, %v1182_v38 }
 0x138   : > { %v1239_v25 = vadd.f32 %v1238_v19, %v1237_v12 }
 0x139   : > { %v1186_v39 = vadd.f32 %v1185_v18, %v1184_v57 }
 0x13a   : > { %v1241_v27 = vadd.f32 %v1240_v20, %v1239_v25 }
 0x13b   : > { %v1187_v32 = vrot.slane %v1186_v39, 4 }
 0x13c   : > { %v1242_v22 = vrot.slane %v1241_v27, 4 }
 0x13d   : > { %v1188_v46 = vadd.f32 %v1187_v32, %v1186_v39 }
 0x13e   : > { %v1243_v30 = vadd.f32 %v1242_v22, %v1241_v27 }
 0x13f   : > { %v1189_v62 = vrot.slane %v1188_v46, 2 }
 0x140   : > { %v1244_v49 = vrot.slane %v1243_v30, 2 }
 0x141   : > { %v1190_v28 = vadd.f32 %v1189_v62, %v1188_v46 }
 0x142   : > { %v1245_v0 = vadd.f32 %v1244_v49, %v1243_v30 }
 0x143   : > { %v1191_v53 = vrot.slane %v1190_v28, 1 }
 0x144   : > { %v1246_v59 = vrot.slane %v1245_v0, 1 }
 0x145   : > { %v1192_v48 = vadd.f32 %v1191_v53, %v1190_v28 }
 0x146   : > { %v1247_v24 = vadd.f32 %v1246_v59, %v1245_v0 }
 0x147   : > { %1194 = vst.msk [vmem:[%s214_s20] sm:$0x1] %vm1193_vm8, %v1192_v48 }
 0x148   : > { %1248 = vst.msk [vmem:[%s214_s20 + $0x1] sm:$0x1] %vm1193_vm8, %v1247_v24 }
 0x149 PF: > { %s15_s15 = sadd.s32 1, %s1658_s15  }
 0x14a   : > { %p12_p6 = scmp.ge.s32.totalorder %s15_s15, 6  }
 0x14c   :  { %14 = sbr.rel (!%p12_p6) target bundleno = 1 (0x1), region = 76 }

</bundles_post_ra>
